<compile_context>
chip_gen: v7x
topology: tpu7x:2x2x1
jax: 0.10.0
libtpu: 0.0.40
codegen_flags: <defaults>
</compile_context>

<pallas_src>
import functools

import numpy as np

import jax
import jax.numpy as jnp
from jax.experimental import pallas as pl
from jax.experimental.pallas import tpu as pltpu

HIDDEN = 768                              # fixed by the module (conv width 768)
KERNEL_SIZES = (2, 3, 4, 5)               # conv1..conv4 kernel heights
N_CONV_COLS = sum(KERNEL_SIZES)           # 14 stacked filter rows
CONV_LANES = 128                          # zero-padded lane width of the matmul output
MAX_K = max(KERNEL_SIZES)                 # 5
_COL_OFFSETS = tuple(sum(KERNEL_SIZES[:i]) for i in range(len(KERNEL_SIZES)))  # (0,2,5,9)


# ----------------------------- Pallas kernel ------------------------------ #
def _bert_cnn_feats_kernel(y_ref, w_ref, masks_ref, sel_ref, bias_ref, valid_ref,
                           o_ref, *, seq_len):
    """One grid step = Bt batch elements.

    y_ref:     (Bt*S, 768) bf16  flattened (batch, position) rows
    w_ref:     (768, 128)  bf16  [w1.T | w2.T | w3.T | w4.T | 0-pad]   (resident)
    masks_ref: (5, 128)    f32   masks[j, c] = 1 iff lane c carries row-shift j
    sel_ref:   (128, 128)  f32   sel[c, f]  = 1 iff lane c belongs to filter f
    bias_ref:  (1, 128)    f32   conv biases in lanes 0..3
    valid_ref: (S, 128)    f32   valid[i, f] = 1 iff window start i fits filter f
    o_ref:     (Bt, 128)   f32   pooled features in lanes 0..3 (lane-dense slab)
    """
    S = seq_len
    R = y_ref.shape[0]
    Bt = R // S

    # (1) every filter-row product in one MXU matmul (bf16 in, f32 accumulate):
    #     P[b*S + i, col_f + j] = <y[b, i, :], w_f[j, :]>
    P = jnp.dot(y_ref[...], w_ref[...], preferred_element_type=jnp.float32)  # (R,128)

    # (2) row-align the products: aligned[r, c] = P[r + shift(c), c].
    #     Shifts are XLU rolls (positive amount R-j == -j mod R, no VMEM slab
    #     copies).  Wrapped / cross-sequence rows only ever land on window
    #     positions that `valid` masks to zero below.
    m = masks_ref[...]                                               # (5,128)
    aligned = P * m[0:1, :]
    for j in range(1, MAX_K):                                        # static unroll, 4
        aligned = aligned + pltpu.roll(P, R - j, 0) * m[j:j + 1, :]

    # (3) per-filter window sums via a single selector matmul (MXU, f32):
    #     conv[r, f] = sum_{c in filter f's lanes} aligned[r, c]
    conv = jnp.dot(aligned, sel_ref[...],
                   preferred_element_type=jnp.float32)               # (R,128)

    # (4) bias + ReLU, zero invalid window starts (exact: ReLU >= 0 precedes the
    #     max), then max-pool over sequence positions.
    conv3 = conv.reshape(Bt, S, CONV_LANES)                          # layout-preserving
    z = jnp.maximum(conv3 + bias_ref[...][None], 0.0) * valid_ref[...][None]
    o_ref[...] = jnp.max(z, axis=1)                                  # (Bt, 128)


# ------------------------ constant / weight packing ------------------------ #
def prep_conv_weights(conv_ws):
    """Fuse conv1..conv4 weights into one zero-padded (768, 128) bf16 matrix."""
    cols = jnp.concatenate([w.T for w in conv_ws], axis=1)           # (768, 14)
    pad = jnp.zeros((HIDDEN, CONV_LANES - cols.shape[1]), cols.dtype)
    return jnp.concatenate([cols, pad], axis=1).astype(jnp.bfloat16)


def prep_conv_bias(conv_bs):
    """Conv biases broadcast into output lanes 0..3 of a (1, 128) row."""
    return (jnp.zeros((1, CONV_LANES), jnp.float32)
            .at[0, :len(conv_bs)].set(jnp.stack(conv_bs)))


def prep_lane_tables(seq_len):
    """Precomputed lane tables: shift masks, filter selector, valid-window mask."""
    S = seq_len
    masks = np.zeros((MAX_K, CONV_LANES), np.float32)
    sel = np.zeros((CONV_LANES, CONV_LANES), np.float32)
    valid = np.zeros((S, CONV_LANES), np.float32)
    for f, (k, col) in enumerate(zip(KERNEL_SIZES, _COL_OFFSETS)):
        for j in range(k):
            masks[j, col + j] = 1.0
            sel[col + j, f] = 1.0
        valid[: S - k + 1, f] = 1.0
    return jnp.asarray(masks), jnp.asarray(sel), jnp.asarray(valid)


# ------------------------- block-size / VMEM config ------------------------ #
def _default_block_cfg():
    """(block_b cap, vmem_limit_bytes): bigger tiles where physical VMEM allows."""
    try:
        info = pltpu.get_tpu_info()
        vmem = int(getattr(info, "vmem_capacity_bytes", 0) or 0)
    except Exception:                     # no info -> be conservative (v7x-safe)
        vmem = 0
    if vmem >= 100 * 1024 * 1024:         # v5e / v6e class parts (128 MiB VMEM)
        return 512, 96 * 1024 * 1024
    return 256, 48 * 1024 * 1024          # v7x class parts (64 MiB VMEM)


def _choose_bt(batch, cap):
    """Batch-block size: multiple of 8, <= cap, grid of ~4 blocks when possible,
    and a divisor of `batch` when batch % 8 == 0 (avoids any padding copy)."""
    desired = max(8, min(cap, (batch // 4) // 8 * 8))
    if batch % 8 == 0:
        floor = min(desired, 64)
        for bt in range(desired, floor - 1, -8):
            if batch % bt == 0:
                return bt
    return desired


# ------------------------------- wrappers ---------------------------------- #
def _run_feature_blocks(y_blk, consts, Bt, vmem_limit):
    """Run the kernel over y_blk (Bm, S, 768) bf16 with Bm % Bt == 0."""
    w_pad, masks, sel, bias_lane, valid = consts
    Bm, S, H = y_blk.shape
    nb = Bm // Bt
    y_flat = y_blk.reshape(Bm * S, H)          # metadata-only reshape

    flops = 2 * Bm * S * (H + CONV_LANES) * CONV_LANES
    bytes_accessed = (y_flat.size * 2 + w_pad.size * 2 + Bm * CONV_LANES * 4
                      + (masks.size + sel.size + bias_lane.size + valid.size) * 4)

    return pl.pallas_call(
        functools.partial(_bert_cnn_feats_kernel, seq_len=S),
        out_shape=jax.ShapeDtypeStruct((Bm, CONV_LANES), jnp.float32),
        grid_spec=pltpu.PrefetchScalarGridSpec(
            num_scalar_prefetch=0,
            grid=(nb,),
            in_specs=[
                pl.BlockSpec((Bt * S, H), lambda b: (b, 0)),
                pl.BlockSpec((H, CONV_LANES), lambda b: (0, 0)),        # resident
                pl.BlockSpec((MAX_K, CONV_LANES), lambda b: (0, 0)),    # resident
                pl.BlockSpec((CONV_LANES, CONV_LANES), lambda b: (0, 0)),
                pl.BlockSpec((1, CONV_LANES), lambda b: (0, 0)),
                pl.BlockSpec((S, CONV_LANES), lambda b: (0, 0)),
            ],
            out_specs=pl.BlockSpec((Bt, CONV_LANES), lambda b: (b, 0)),
        ),
        compiler_params=pltpu.CompilerParams(
            # independent batch blocks -> both v7x TensorCores can take blocks
            dimension_semantics=("parallel",),
            vmem_limit_bytes=vmem_limit,
        ),
        cost_estimate=pl.CostEstimate(
            flops=flops, transcendentals=0, bytes_accessed=bytes_accessed),
    )(y_flat, w_pad, masks, sel, bias_lane, valid)


def bert_cnn_features_pallas(y_bf16, consts, *, block_b=None, vmem_limit=None):
    """y_bf16: (B, S, 768) bf16 BERT embedding.  Returns (B, 4) f32 pooled feats."""
    B, S, H = y_bf16.shape
    assert H == HIDDEN
    assert S >= MAX_K and S % 8 == 0, "seq length must be >= 5 and a multiple of 8"
    if block_b is None or vmem_limit is None:
        bb, vl = _default_block_cfg()
        block_b = block_b or bb
        vmem_limit = vmem_limit or vl

    Bt = _choose_bt(B, block_b)
    nb = B // Bt
    tail = B - nb * Bt

    parts = []
    if nb > 0:
        parts.append(_run_feature_blocks(y_bf16[: nb * Bt], consts, Bt, vmem_limit))
    if tail > 0:
        # Pad only the final chunk (never the whole tensor): one small extra call.
        Bt_t = ((tail + 7) // 8) * 8
        y_t = y_bf16[nb * Bt:]
        if Bt_t != tail:
            y_t = jnp.concatenate(
                [y_t, jnp.zeros((Bt_t - tail, S, H), y_bf16.dtype)], axis=0)
        parts.append(_run_feature_blocks(y_t, consts, Bt_t, vmem_limit)[:tail])

    feats = parts[0] if len(parts) == 1 else jnp.concatenate(parts, axis=0)
    return feats[:, : len(KERNEL_SIZES)]                              # (B, 4)


def bert_cnn_head(y, consts, w_out, b_out, *, block_b=None):
    """Conv+ReLU+maxpool (Pallas) then Linear(4,2)+sigmoid (plain JAX)."""
    # The bf16 cast stays inside the same jit as the embedding producer so it
    # fuses into the producer's output store (no standalone HBM pass).
    y_bf16 = y.astype(jnp.bfloat16)
    feats = bert_cnn_features_pallas(y_bf16, consts, block_b=block_b)
    logits = jnp.dot(feats, w_out.T, precision=jax.lax.Precision.HIGHEST) + b_out
    return jax.nn.sigmoid(logits)                                     # (B, 2)


# --------------------- BertEmbedding deterministic stand-in ---------------- #
# TODO(synk): the pretrained 'bert-base-uncased' encoder has no clean Pallas
# equivalent here; a deterministic stand-in produces 13 hidden states and we
# reproduce `stack(hiddens)[9:].mean(dim=0)` exactly on top of it.
def fake_bert_embedding(ids, mask, emb_table, layer_gain, layer_bias):
    emb = emb_table[ids]                                   # (B, S, H)
    emb = emb * mask[..., None].astype(emb.dtype)
    hiddens = (emb[None, ...] * layer_gain[:, None, None, :]
               + layer_bias[:, None, None, :])             # (13, B, S, H)
    return jnp.mean(hiddens[9:], axis=0)                   # (B, S, H)


@jax.jit
def full_forward(ids, mask, emb_table, layer_gain, layer_bias, consts, w_out, b_out):
    """Embedding producer + bf16 cast + Pallas CNN head in ONE XLA computation."""
    y = fake_bert_embedding(ids, mask, emb_table, layer_gain, layer_bias)
    return bert_cnn_head(y, consts, w_out, b_out)


# ------------------------------ pure-JAX ref ------------------------------- #
def reference_forward(y, conv_ws, conv_bs, w_out, b_out):
    # Uses the same bf16 input quantization as the Pallas path; math in f32.
    yq = y.astype(jnp.bfloat16).astype(jnp.float32)
    B, S, H = y.shape
    feats = []
    for w, b in zip(conv_ws, conv_bs):
        wq = w.astype(jnp.bfloat16).astype(jnp.float32)
        k = w.shape[0]
        cols = []
        for i in range(S - k + 1):
            cols.append(jnp.einsum("bkh,kh->b", yq[:, i:i + k, :], wq,
                                   precision=jax.lax.Precision.HIGHEST) + b)
        conv = jax.nn.relu(jnp.stack(cols, axis=1))         # (B, S-k+1)
        feats.append(jnp.max(conv, axis=1))                 # maxpool
    f = jnp.stack(feats, axis=1)                            # (B, 4)
    logits = jnp.dot(f, w_out.T, precision=jax.lax.Precision.HIGHEST) + b_out
    return jax.nn.sigmoid(logits)


# ---------------------------------- main ----------------------------------- #
if __name__ == "__main__":
    B, S, VOCAB = 8, 16, 50                # sentence_max_size = 16
    key = jax.random.PRNGKey(0)
    keys = jax.random.split(key, 12)

    # deterministic "pretrained" stand-in params
    emb_table = 0.02 * jax.random.normal(keys[0], (VOCAB, HIDDEN), jnp.float32)
    layer_gain = 1.0 + 0.1 * jax.random.normal(keys[1], (13, HIDDEN), jnp.float32)
    layer_bias = 0.01 * jax.random.normal(keys[2], (13, HIDDEN), jnp.float32)

    # conv1..conv4: Conv2d(1,1,(k,768)) -> weight (k,768), bias scalar
    conv_ws, conv_bs = [], []
    for i, k in enumerate(KERNEL_SIZES):
        conv_ws.append(0.05 * jax.random.normal(keys[3 + i], (k, HIDDEN), jnp.float32))
        conv_bs.append(jnp.float32(0.01 * (i + 1)))

    w_pad = prep_conv_weights(conv_ws)                      # (768, 128) bf16
    bias_lane = prep_conv_bias(conv_bs)                     # (1, 128) f32
    masks, sel, valid = prep_lane_tables(S)                 # (5,128),(128,128),(S,128)
    consts = (w_pad, masks, sel, bias_lane, valid)

    # Linear(4, 2)
    w_out = 0.5 * jax.random.normal(keys[8], (2, 4), jnp.float32)
    b_out = 0.1 * jax.random.normal(keys[9], (2,), jnp.float32)

    # inputs
    ids = jax.random.randint(keys[10], (B, S), 0, VOCAB, jnp.int32)
    mask = jnp.ones((B, S), jnp.int32)

    # forward: fake BERT embedding + bf16 cast + Pallas CNN head under one jit
    out = full_forward(ids, mask, emb_table, layer_gain, layer_bias,
                       consts, w_out, b_out)
    out = jax.block_until_ready(out)

    # reference (same bf16 quantization of y / conv weights, f32 math)
    y = fake_bert_embedding(ids, mask, emb_table, layer_gain, layer_bias)
    ref = reference_forward(y, conv_ws, conv_bs, w_out, b_out)
    assert out.shape == (B, 2)
    assert jnp.allclose(out, ref, atol=1e-3, rtol=1e-3), (out, ref)
    print("KERNEL_OK")
</pallas_src>

<mosaic_0001>
module attributes {stable_mosaic.version = 11 : i64} {
  func.func @_bert_cnn_feats_kernel(%arg0: i32, %arg1: memref<128x768xbf16, #tpu.memory_space<vmem>>, %arg2: memref<768x128xbf16, #tpu.memory_space<vmem>>, %arg3: memref<5x128xf32, #tpu.memory_space<vmem>>, %arg4: memref<128x128xf32, #tpu.memory_space<vmem>>, %arg5: memref<1x128xf32, #tpu.memory_space<vmem>>, %arg6: memref<16x128xf32, #tpu.memory_space<vmem>>, %arg7: memref<8x128xf32, #tpu.memory_space<vmem>>) attributes {dimension_semantics = [#tpu.dimension_semantics<parallel>], iteration_bounds = array<i64: 1>, scalar_prefetch = 0 : i64, scratch_operands = 0 : i64, tpu.core_type = #tpu.core_type<tc>, window_params = [{transform_indices = @transform_0, window_bounds = array<i64: 128, 768>}, {pipeline_mode = #tpu.pipeline_mode<synchronous>, transform_indices = @transform_1, window_bounds = array<i64: 768, 128>}, {pipeline_mode = #tpu.pipeline_mode<synchronous>, transform_indices = @transform_2, window_bounds = array<i64: 5, 128>}, {pipeline_mode = #tpu.pipeline_mode<synchronous>, transform_indices = @transform_3, window_bounds = array<i64: 128, 128>}, {pipeline_mode = #tpu.pipeline_mode<synchronous>, transform_indices = @transform_4, window_bounds = array<i64: 1, 128>}, {pipeline_mode = #tpu.pipeline_mode<synchronous>, transform_indices = @transform_5, window_bounds = array<i64: 16, 128>}, {transform_indices = @transform_6, window_bounds = array<i64: 8, 128>}]} {
    %c0 = arith.constant 0 : index
    %c0_0 = arith.constant 0 : index
    %0 = vector.load %arg1[%c0, %c0_0] : memref<128x768xbf16, #tpu.memory_space<vmem>>, vector<128x768xbf16>
    %c0_1 = arith.constant 0 : index
    %c0_2 = arith.constant 0 : index
    %1 = vector.load %arg2[%c0_1, %c0_2] : memref<768x128xbf16, #tpu.memory_space<vmem>>, vector<768x128xbf16>
    %cst = arith.constant dense<0.000000e+00> : vector<128x128xf32>
    %2 = tpu.matmul %0, %1, %cst {dimension_numbers = #tpu.dot_dimension_numbers<[1], [0], [0], [1], [0, 0, 1, 1], [], []>} : vector<128x768xbf16>, vector<768x128xbf16>, vector<128x128xf32> -> vector<128x128xf32>
    %c0_3 = arith.constant 0 : index
    %c0_4 = arith.constant 0 : index
    %3 = vector.load %arg3[%c0_3, %c0_4] : memref<5x128xf32, #tpu.memory_space<vmem>>, vector<5x128xf32>
    %4 = vector.extract_strided_slice %3 {offsets = [0, 0], sizes = [1, 128], strides = [1, 1]} : vector<5x128xf32> to vector<1x128xf32>
    %5 = vector.broadcast %4 : vector<1x128xf32> to vector<128x128xf32>
    %6 = arith.mulf %2, %5 : vector<128x128xf32>
    %c127_i32 = arith.constant 127 : i32
    %7 = tpu.dynamic_rotate %2 by %c127_i32 dim 0 : vector<128x128xf32>, i32 -> vector<128x128xf32>
    %8 = vector.extract_strided_slice %3 {offsets = [1, 0], sizes = [1, 128], strides = [1, 1]} : vector<5x128xf32> to vector<1x128xf32>
    %9 = vector.broadcast %8 : vector<1x128xf32> to vector<128x128xf32>
    %10 = arith.mulf %7, %9 : vector<128x128xf32>
    %11 = arith.addf %6, %10 : vector<128x128xf32>
    %c126_i32 = arith.constant 126 : i32
    %12 = tpu.dynamic_rotate %2 by %c126_i32 dim 0 : vector<128x128xf32>, i32 -> vector<128x128xf32>
    %13 = vector.extract_strided_slice %3 {offsets = [2, 0], sizes = [1, 128], strides = [1, 1]} : vector<5x128xf32> to vector<1x128xf32>
    %14 = vector.broadcast %13 : vector<1x128xf32> to vector<128x128xf32>
    %15 = arith.mulf %12, %14 : vector<128x128xf32>
    %16 = arith.addf %11, %15 : vector<128x128xf32>
    %c125_i32 = arith.constant 125 : i32
    %17 = tpu.dynamic_rotate %2 by %c125_i32 dim 0 : vector<128x128xf32>, i32 -> vector<128x128xf32>
    %18 = vector.extract_strided_slice %3 {offsets = [3, 0], sizes = [1, 128], strides = [1, 1]} : vector<5x128xf32> to vector<1x128xf32>
    %19 = vector.broadcast %18 : vector<1x128xf32> to vector<128x128xf32>
    %20 = arith.mulf %17, %19 : vector<128x128xf32>
    %21 = arith.addf %16, %20 : vector<128x128xf32>
    %c124_i32 = arith.constant 124 : i32
    %22 = tpu.dynamic_rotate %2 by %c124_i32 dim 0 : vector<128x128xf32>, i32 -> vector<128x128xf32>
    %23 = vector.extract_strided_slice %3 {offsets = [4, 0], sizes = [1, 128], strides = [1, 1]} : vector<5x128xf32> to vector<1x128xf32>
    %24 = vector.broadcast %23 : vector<1x128xf32> to vector<128x128xf32>
    %25 = arith.mulf %22, %24 : vector<128x128xf32>
    %26 = arith.addf %21, %25 : vector<128x128xf32>
    %c0_5 = arith.constant 0 : index
    %c0_6 = arith.constant 0 : index
    %27 = vector.load %arg4[%c0_5, %c0_6] : memref<128x128xf32, #tpu.memory_space<vmem>>, vector<128x128xf32>
    %cst_7 = arith.constant dense<0.000000e+00> : vector<128x128xf32>
    %28 = tpu.matmul %26, %27, %cst_7 {dimension_numbers = #tpu.dot_dimension_numbers<[1], [0], [0], [1], [0, 0, 1, 1], [], []>} : vector<128x128xf32>, vector<128x128xf32>, vector<128x128xf32> -> vector<128x128xf32>
    %29 = vector.shape_cast %28 : vector<128x128xf32> to vector<8x16x128xf32>
    %c0_8 = arith.constant 0 : index
    %c0_9 = arith.constant 0 : index
    %30 = vector.load %arg5[%c0_8, %c0_9] : memref<1x128xf32, #tpu.memory_space<vmem>>, vector<1x128xf32>
    %31 = vector.shape_cast %30 : vector<1x128xf32> to vector<1x1x128xf32>
    %32 = vector.broadcast %31 : vector<1x1x128xf32> to vector<8x16x128xf32>
    %33 = arith.addf %29, %32 : vector<8x16x128xf32>
    %cst_10 = arith.constant 0.000000e+00 : f32
    %34 = vector.broadcast %cst_10 : f32 to vector<8x16x128xf32>
    %35 = arith.maximumf %33, %34 : vector<8x16x128xf32>
    %c0_11 = arith.constant 0 : index
    %c0_12 = arith.constant 0 : index
    %36 = vector.load %arg6[%c0_11, %c0_12] : memref<16x128xf32, #tpu.memory_space<vmem>>, vector<16x128xf32>
    %37 = vector.shape_cast %36 : vector<16x128xf32> to vector<1x16x128xf32>
    %38 = vector.broadcast %37 : vector<1x16x128xf32> to vector<8x16x128xf32>
    %39 = arith.mulf %35, %38 : vector<8x16x128xf32>
    %cst_13 = arith.constant dense<0xFF800000> : vector<8x128xf32>
    %40 = vector.multi_reduction <maximumf>, %39, %cst_13 [1] : vector<8x16x128xf32> to vector<8x128xf32>
    %c0_14 = arith.constant 0 : index
    %c0_15 = arith.constant 0 : index
    %41 = vector.load %arg7[%c0_14, %c0_15] : memref<8x128xf32, #tpu.memory_space<vmem>>, vector<8x128xf32>
    tpu.vector_store %arg7[%c0_14, %c0_15], %40 {strides = array<i32>} : memref<8x128xf32, #tpu.memory_space<vmem>>, vector<8x128xf32>,
    return
  }
  func.func @transform_0(%arg0: i32) -> (i32, i32) {
    %c0_i32 = arith.constant 0 : i32
    %c0_i32_0 = arith.constant 0 : i32
    return %arg0, %c0_i32 : i32, i32
  }
  func.func @transform_1(%arg0: i32) -> (i32, i32) {
    %c0_i32 = arith.constant 0 : i32
    %c0_i32_0 = arith.constant 0 : i32
    %c0_i32_1 = arith.constant 0 : i32
    return %c0_i32, %c0_i32_0 : i32, i32
  }
  func.func @transform_2(%arg0: i32) -> (i32, i32) {
    %c0_i32 = arith.constant 0 : i32
    %c0_i32_0 = arith.constant 0 : i32
    %c0_i32_1 = arith.constant 0 : i32
    return %c0_i32, %c0_i32_0 : i32, i32
  }
  func.func @transform_3(%arg0: i32) -> (i32, i32) {
    %c0_i32 = arith.constant 0 : i32
    %c0_i32_0 = arith.constant 0 : i32
    %c0_i32_1 = arith.constant 0 : i32
    return %c0_i32, %c0_i32_0 : i32, i32
  }
  func.func @transform_4(%arg0: i32) -> (i32, i32) {
    %c0_i32 = arith.constant 0 : i32
    %c0_i32_0 = arith.constant 0 : i32
    %c0_i32_1 = arith.constant 0 : i32
    return %c0_i32, %c0_i32_0 : i32, i32
  }
  func.func @transform_5(%arg0: i32) -> (i32, i32) {
    %c0_i32 = arith.constant 0 : i32
    %c0_i32_0 = arith.constant 0 : i32
    %c0_i32_1 = arith.constant 0 : i32
    return %c0_i32, %c0_i32_0 : i32, i32
  }
  func.func @transform_6(%arg0: i32) -> (i32, i32) {
    %c0_i32 = arith.constant 0 : i32
    %c0_i32_0 = arith.constant 0 : i32
    return %arg0, %c0_i32 : i32, i32
  }
}

</mosaic_0001>

<bundles_post_ra>
// kernel: full_forward.1
= control target key start
LH: loop header
LB: loop body
LE: loop exit
PB: predicated region body
PF: predicated region fallthrough
CT: control target
= control target key end

     0   :  { %vm1568_vm4 = vcmask 1041409   ;;  %vm1570_vm5 = vcmask 1042434   ;;  %vm1572_vm6 = vcmask 1043459   ;;  %vm1574_vm7 = vcmask 1044484   ;;  %s2968_s1 = inlined_call_operand.vmem [shape: bf16[768,128], index: 1, kind: input, shape index: {}]   ;;  %s2969_s0 = inlined_call_operand.vmem [shape: bf16[128,768], index: 0, kind: input, shape index: {}]   ;;  %s2970_s3 = inlined_call_operand.vmem [shape: f32[128,128], index: 3, kind: input, shape index: {}]   ;;  %s2971_s2 = inlined_call_operand.vmem [shape: f32[5,128], index: 2, kind: input, shape index: {}]   ;;  %s2972_s4 = inlined_call_operand.vmem [shape: f32[1,128], index: 4, kind: input, shape index: {}]   ;;  %s2973_s5 = inlined_call_operand.vmem [shape: f32[16,128], index: 5, kind: input, shape index: {}]   ;;  %s2974_s6 = inlined_call_operand.vmem [shape: f32[8,128], index: 6, kind: output, shape index: {}]  }
   0x1   :  { %v1997_v0 = vld [vmem:[%s2968_s1 + $0x40] sm:$0xff]   ;;  %v2001_v4 = vld [vmem:[%s2968_s1 + $0x48] sm:$0xff]   ;;  %v2005_v8 = vld [vmem:[%s2968_s1 + $0x50] sm:$0xff]   ;;  %vm1576_vm8 = vcmask 1045509   ;;  %vm1578_vm9 = vcmask 1046534   ;;  %vm1580_vm10 = vcmask 1047559  }
   0x2   :  { %v1998_v1 = vld [vmem:[%s2968_s1 + $0xc0] sm:$0xff]   ;;  %1685 = vmatprep.subr.bf16.mxu0 %v1997_v0  ;;  %v2002_v5 = vld [vmem:[%s2968_s1 + $0xc8] sm:$0xff]   ;;  %v2006_v9 = vld [vmem:[%s2968_s1 + $0xd0] sm:$0xff]  }
   0x3   :  { %v1999_v2 = vld [vmem:[%s2968_s1] sm:$0xff]   ;;  %1749 = vmatprep.subr.bf16.mxu1 %v1998_v1  ;;  %v2003_v6 = vld [vmem:[%s2968_s1 + $0x8] sm:$0xff]   ;;  %v2007_v10 = vld [vmem:[%s2968_s1 + $0x10] sm:$0xff]  }
   0x4   :  { %v2000_v3 = vld [vmem:[%s2968_s1 + $0x80] sm:$0xff]   ;;  %1686 = vmatpush3.bf16.msra.mxu0 %v1999_v2  ;;  %v2004_v7 = vld [vmem:[%s2968_s1 + $0x88] sm:$0xff]   ;;  %v2008_v11 = vld [vmem:[%s2968_s1 + $0x90] sm:$0xff]  }
   0x5   :  { %1750 = vmatpush3.bf16.msra.mxu1 %v2000_v3  ;;  %1687 = vmatprep.subr.bf16.mxu0 %v2001_v4  ;;  %v2009_v12 = vld [vmem:[%s2968_s1 + $0x58] sm:$0xff]   ;;  %v2013_v16 = vld [vmem:[%s2968_s1 + $0x60] sm:$0xff]   ;;  %v2017_v20 = vld [vmem:[%s2968_s1 + $0x68] sm:$0xff]  }
   0x6   :  { %1751 = vmatprep.subr.bf16.mxu1 %v2002_v5  ;;  %v2010_v13 = vld [vmem:[%s2968_s1 + $0xd8] sm:$0xff]   ;;  %v2014_v17 = vld [vmem:[%s2968_s1 + $0xe0] sm:$0xff]   ;;  %v2018_v21 = vld [vmem:[%s2968_s1 + $0xe8] sm:$0xff]  }
   0x7   :  { %v2011_v14 = vld [vmem:[%s2968_s1 + $0x18] sm:$0xff]   ;;  %v2015_v18 = vld [vmem:[%s2968_s1 + $0x20] sm:$0xff]   ;;  %v2019_v22 = vld [vmem:[%s2968_s1 + $0x28] sm:$0xff]  }
   0x8   :  { %1688 = vmatpush3.bf16.msra.mxu0 %v2003_v6  ;;  %v2012_v15 = vld [vmem:[%s2968_s1 + $0x98] sm:$0xff]   ;;  %v2016_v19 = vld [vmem:[%s2968_s1 + $0xa0] sm:$0xff]   ;;  %v2020_v23 = vld [vmem:[%s2968_s1 + $0xa8] sm:$0xff]  }
   0x9   :  { %1752 = vmatpush3.bf16.msra.mxu1 %v2004_v7  ;;  %1689 = vmatprep.subr.bf16.mxu0 %v2005_v8  ;;  %v2021_v24 = vld [vmem:[%s2968_s1 + $0x70] sm:$0xff]   ;;  %v2025_v28 = vld [vmem:[%s2968_s1 + $0x78] sm:$0xff]   ;;  %v2032_v34 = vld [vmem:[%s2969_s0 + $0x8] ss:$24 sps:$4 sm:$0xff]  }
   0xa   :  { %1753 = vmatprep.subr.bf16.mxu1 %v2006_v9  ;;  %v2022_v25 = vld [vmem:[%s2968_s1 + $0xf0] sm:$0xff]   ;;  %v2026_v29 = vld [vmem:[%s2968_s1 + $0xf8] sm:$0xff]   ;;  %v2034_v35 = vld [vmem:[%s2969_s0 + $0xc] ss:$24 sps:$4 sm:$0xff]  }
   0xb   :  { %v2023_v26 = vld [vmem:[%s2968_s1 + $0x30] sm:$0xff]   ;;  %v2027_v30 = vld [vmem:[%s2968_s1 + $0x38] sm:$0xff]   ;;  %v2035_v36 = vld [vmem:[%s2968_s1 + $0x140] sm:$0xff]   ;;  %825 = vmatprep.mubr.bf16.mxu1 %v2034_v35 }
   0xc   :  { %1690 = vmatpush3.bf16.msra.mxu0 %v2007_v10  ;;  %v2024_v27 = vld [vmem:[%s2968_s1 + $0xb0] sm:$0xff]   ;;  %v2028_v31 = vld [vmem:[%s2968_s1 + $0xb8] sm:$0xff]   ;;  %v2036_v37 = vld [vmem:[%s2968_s1 + $0x100] sm:$0xff]  }
   0xd   :  { %1754 = vmatpush3.bf16.msra.mxu1 %v2008_v11  ;;  %1691 = vmatprep.subr.bf16.mxu0 %v2009_v12  ;;  %v2029_v32 = vld [vmem:[%s2969_s0] ss:$24 sps:$4 sm:$0xff]   ;;  %v2031_v33 = vld [vmem:[%s2969_s0 + $0x4] ss:$24 sps:$4 sm:$0xff]   ;;  %v2037_v38 = vld [vmem:[%s2969_s0 + $0x34] ss:$24 sps:$4 sm:$0xff]  }
   0xe   :  { %1755 = vmatprep.subr.bf16.mxu1 %v2010_v13  ;;  %728 = vmatprep.mubr.bf16.mxu0 %v2031_v33  ;;  %v2039_v39 = vld [vmem:[%s2969_s0 + $0x3c] ss:$24 sps:$4 sm:$0xff]   ;;  %v2041_v40 = vld [vmem:[%s2969_s0 + $0x30] ss:$24 sps:$4 sm:$0xff]   ;;  %v2047_v45 = vld [vmem:[%s2969_s0 + $0x6c] ss:$24 sps:$4 sm:$0xff]  }
   0xf   :  { %v2042_v41 = vld [vmem:[%s2969_s0 + $0x38] ss:$24 sps:$4 sm:$0xff]   ;;  %v2043_v42 = vld [vmem:[%s2968_s1 + $0x148] sm:$0xff]   ;;  %v2045_v44 = vld [vmem:[%s2969_s0 + $0x64] ss:$24 sps:$4 sm:$0xff]  }
  0x10   :  { %1692 = vmatpush3.bf16.msra.mxu0 %v2011_v14  ;;  %v2044_v43 = vld [vmem:[%s2968_s1 + $0x108] sm:$0xff]   ;;  %v2051_v46 = vld [vmem:[%s2968_s1 + $0x150] sm:$0xff]   ;;  %v2049_v48 = vld [vmem:[%s2969_s0 + $0x60] ss:$24 sps:$4 sm:$0xff]  }
  0x11   :  { %1756 = vmatpush3.bf16.msra.mxu1 %v2012_v15  ;;  %1693 = vmatprep.subr.bf16.mxu0 %v2013_v16  ;;  %v2052_v47 = vld [vmem:[%s2968_s1 + $0x110] sm:$0xff]   ;;  %v2050_v49 = vld [vmem:[%s2969_s0 + $0x68] ss:$24 sps:$4 sm:$0xff]   ;;  %v2059_v52 = vld [vmem:[%s2968_s1 + $0x158] sm:$0xff]  }
  0x12   :  { %1757 = vmatprep.subr.bf16.mxu1 %v2014_v17  ;;  %v2053_v50 = vld [vmem:[%s2969_s0 + $0x94] ss:$24 sps:$4 sm:$0xff]   ;;  %v2060_v53 = vld [vmem:[%s2968_s1 + $0x118] sm:$0xff]   ;;  %v2067_v54 = vld [vmem:[%s2968_s1 + $0x160] sm:$0xff]  }
  0x13   :  { %v2055_v51 = vld [vmem:[%s2969_s0 + $0x9c] ss:$24 sps:$4 sm:$0xff]   ;;  %v2068_v55 = vld [vmem:[%s2968_s1 + $0x120] sm:$0xff]   ;;  %v2057_v56 = vld [vmem:[%s2969_s0 + $0x90] ss:$24 sps:$4 sm:$0xff]  }
  0x14   :  { %1694 = vmatpush3.bf16.msra.mxu0 %v2015_v18  ;;  %v2058_v57 = vld [vmem:[%s2969_s0 + $0x98] ss:$24 sps:$4 sm:$0xff]   ;;  %v2061_v58 = vld [vmem:[%s2969_s0 + $0xc4] ss:$24 sps:$4 sm:$0xff]   ;;  %v2075_v60 = vld [vmem:[%s2968_s1 + $0x168] sm:$0xff]  }
  0x15   :  { %1758 = vmatpush3.bf16.msra.mxu1 %v2016_v19  ;;  %1695 = vmatprep.subr.bf16.mxu0 %v2017_v20  ;;  %v2063_v59 = vld [vmem:[%s2969_s0 + $0xcc] ss:$24 sps:$4 sm:$0xff]   ;;  %v2065_v62 = vld [vmem:[%s2969_s0 + $0xc0] ss:$24 sps:$4 sm:$0xff]   ;;  %v2083_v0 = vld [vmem:[%s2968_s1 + $0x170] sm:$0xff]  }
  0x16   :  { %1759 = vmatprep.subr.bf16.mxu1 %v2018_v21  ;;  %v2076_v61 = vld [vmem:[%s2968_s1 + $0x128] sm:$0xff]   ;;  %v2084_v1 = vld [vmem:[%s2968_s1 + $0x130] sm:$0xff]   ;;  %v2091_v4 = vld [vmem:[%s2968_s1 + $0x178] sm:$0xff]  }
  0x17   :  { %v2066_v63 = vld [vmem:[%s2969_s0 + $0xc8] ss:$24 sps:$4 sm:$0xff]   ;;  %v2069_v2 = vld [vmem:[%s2969_s0 + $0xf4] ss:$24 sps:$4 sm:$0xff]   ;;  %v2092_v5 = vld [vmem:[%s2968_s1 + $0x138] sm:$0xff]  }
  0x18   :  { %1696 = vmatpush3.bf16.msra.mxu0 %v2019_v22  ;;  %v2071_v3 = vld [vmem:[%s2969_s0 + $0xfc] ss:$24 sps:$4 sm:$0xff]   ;;  %v2073_v6 = vld [vmem:[%s2969_s0 + $0xf0] ss:$24 sps:$4 sm:$0xff]   ;;  %v2079_v9 = vld [vmem:[%s2969_s0 + $0x12c] ss:$24 sps:$4 sm:$0xff]  }
  0x19   :  { %1760 = vmatpush3.bf16.msra.mxu1 %v2020_v23  ;;  %1697 = vmatprep.subr.bf16.mxu0 %v2021_v24  ;;  %v2074_v7 = vld [vmem:[%s2969_s0 + $0xf8] ss:$24 sps:$4 sm:$0xff]   ;;  %v2077_v8 = vld [vmem:[%s2969_s0 + $0x124] ss:$24 sps:$4 sm:$0xff]   ;;  %v2082_v11 = vld [vmem:[%s2969_s0 + $0x128] ss:$24 sps:$4 sm:$0xff]  }
  0x1a   :  { %1761 = vmatprep.subr.bf16.mxu1 %v2022_v25  ;;  %v2081_v10 = vld [vmem:[%s2969_s0 + $0x120] ss:$24 sps:$4 sm:$0xff]   ;;  %v2085_v12 = vld [vmem:[%s2969_s0 + $0x154] ss:$24 sps:$4 sm:$0xff]   ;;  %v2089_v14 = vld [vmem:[%s2969_s0 + $0x150] ss:$24 sps:$4 sm:$0xff]  }
  0x1b   :  { %v2087_v13 = vld [vmem:[%s2969_s0 + $0x15c] ss:$24 sps:$4 sm:$0xff]   ;;  %v2090_v15 = vld [vmem:[%s2969_s0 + $0x158] ss:$24 sps:$4 sm:$0xff]   ;;  %v1287_v33 = vld [vmem:[%s2970_s3 + $0x8] sm:$0xff] }
  0x1c   :  { %1698 = vmatpush3.bf16.msra.mxu0 %v2023_v26  ;;  %v2095_v16 = vld [vmem:[%s2969_s0 + $0x14] ss:$24 sps:$4 sm:$0xff]   ;;  %v2093_v17 = vld [vmem:[%s2969_s0 + $0x10] ss:$24 sps:$4 sm:$0xff]   ;;  %v2096_v18 = vld [vmem:[%s2969_s0 + $0x44] ss:$24 sps:$4 sm:$0xff]  }
  0x1d   :  { %1762 = vmatpush3.bf16.msra.mxu1 %v2024_v27  ;;  %1699 = vmatprep.subr.bf16.mxu0 %v2025_v28  ;;  %v2098_v19 = vld [vmem:[%s2969_s0 + $0x40] ss:$24 sps:$4 sm:$0xff]   ;;  %v2099_v20 = vld [vmem:[%s2969_s0 + $0x74] ss:$24 sps:$4 sm:$0xff]   ;;  %v2101_v21 = vld [vmem:[%s2969_s0 + $0x70] ss:$24 sps:$4 sm:$0xff]  }
  0x1e   :  { %1763 = vmatprep.subr.bf16.mxu1 %v2026_v29  ;;  %v2102_v22 = vld [vmem:[%s2969_s0 + $0xa4] ss:$24 sps:$4 sm:$0xff]   ;;  %v2104_v23 = vld [vmem:[%s2969_s0 + $0xa0] ss:$24 sps:$4 sm:$0xff]   ;;  %v2105_v24 = vld [vmem:[%s2969_s0 + $0xd4] ss:$24 sps:$4 sm:$0xff]  }
  0x1f   :  { %v2107_v25 = vld [vmem:[%s2969_s0 + $0xd0] ss:$24 sps:$4 sm:$0xff]   ;;  %v2108_v26 = vld [vmem:[%s2969_s0 + $0x104] ss:$24 sps:$4 sm:$0xff]   ;;  %v2110_v27 = vld [vmem:[%s2969_s0 + $0x100] ss:$24 sps:$4 sm:$0xff]  }
  0x20   :  { %1700 = vmatpush3.bf16.msra.mxu0 %v2027_v30  ;;  %v2111_v28 = vld [vmem:[%s2969_s0 + $0x134] ss:$24 sps:$4 sm:$0xff]   ;;  %v2113_v29 = vld [vmem:[%s2969_s0 + $0x130] ss:$24 sps:$4 sm:$0xff]   ;;  %v2114_v30 = vld [vmem:[%s2969_s0 + $0x164] ss:$24 sps:$4 sm:$0xff]  }
  0x21   :  { %1764 = vmatpush3.bf16.msra.mxu1 %v2028_v31  ;;  %1813 = vmatprep.subr.bf16.mxu0 %v2035_v36  ;;  %v2116_v31 = vld [vmem:[%s2969_s0 + $0x160] ss:$24 sps:$4 sm:$0xff]   ;;  %v1288_v35 = vld [vmem:[%s2970_s3 + $0x10] sm:$0xff] }
  0x22   :  { %v1289_v36 = vld [vmem:[%s2970_s3 + $0x18] sm:$0xff] }
  0x23   :  { %729 = vmatmul.mubr.bf16.vlgmr.msra.gmra.mrb[0].mxu0 %v2029_v32  ;;  %v1286_v32 = vld [vmem:[%s2970_s3] sm:$0xff] }
  0x24   :  { %826 = vmatmul.mubr.bf16.vlgmr.msra.gmra.mrb[0].mxu1 %v2032_v34  ;;  %1814 = vmatpush3.bf16.msra.mxu0 %v2036_v37  ;;  %v1965_v34 = vpack.c.bf16 %v1287_v33, %v1286_v32  ;;  %v1969_v37 = vpack.c.bf16 %v1289_v36, %v1288_v35 }
  0x25   :  { %736 = vmatprep.mubr.bf16.mxu0 %v2037_v38  ;;  %833 = vmatprep.mubr.bf16.mxu1 %v2039_v39  ;;  %v1290_v38 = vld [vmem:[%s2970_s3 + $0x20] sm:$0xff]  ;;  %v1291_v39 = vld [vmem:[%s2970_s3 + $0x28] sm:$0xff] }
  0x26   :  { %1815 = vmatprep.subr.bf16.mxu0 %v2043_v42  ;;  %1966 = vmatprep.subr.bf16.mxu1 %v1965_v34  ;;  %v1293_v42 = vld [vmem:[%s2970_s3 + $0x38] sm:$0xff] }
  0x27   :  { %1968 = vmatpush3.bf16.msra.mxu1 %v1965_v34 }
  0x28   :  { %1816 = vmatpush3.bf16.msra.mxu0 %v2044_v43  ;;  %1970 = vmatprep.subr.bf16.mxu1 %v1969_v37 }
  0x29   :  { %1817 = vmatprep.subr.bf16.mxu0 %v2051_v46 }
  0x2b   :  { %737 = vmatmul.mubr.bf16.gmra.mrb[4].mxu0 %v2041_v40  ;;  %1972 = vmatpush3.bf16.msra.mxu1 %v1969_v37  ;;  %v1973_v40 = vpack.c.bf16 %v1291_v39, %v1290_v38 }
  0x2c   :  { %834 = vmatmul.mubr.bf16.gmra.mrb[4].mxu1 %v2042_v41  ;;  %744 = vmatprep.mubr.bf16.mxu0 %v2045_v44  ;;  %v1292_v41 = vld [vmem:[%s2970_s3 + $0x30] sm:$0xff]  ;;  %v1294_v44 = vld [vmem:[%s2970_s3 + $0x40] sm:$0xff] }
  0x2d   :  { %841 = vmatprep.mubr.bf16.mxu1 %v2047_v45  ;;  %1818 = vmatpush3.bf16.msra.mxu0 %v2052_v47  ;;  %v1977_v43 = vpack.c.bf16 %v1293_v42, %v1292_v41  ;;  %v1295_v45 = vld [vmem:[%s2970_s3 + $0x48] sm:$0xff]  ;;  %v1296_v47 = vld [vmem:[%s2970_s3 + $0x50] sm:$0xff] }
  0x2e   :  { %1819 = vmatprep.subr.bf16.mxu0 %v2059_v52  ;;  %1974 = vmatprep.subr.bf16.mxu1 %v1973_v40  ;;  %v1981_v46 = vpack.c.bf16 %v1295_v45, %v1294_v44 }
  0x2f   :  { %1976 = vmatpush3.bf16.msra.mxu1 %v1973_v40 }
  0x30   :  { %1978 = vmatprep.subr.bf16.mxu1 %v1977_v43 }
  0x31   :  { %1820 = vmatpush3.bf16.msra.mxu0 %v2060_v53  ;;  %v1300_v53 = vld [vmem:[%s2970_s3 + $0x70] sm:$0xff] }
  0x32   :  { %1821 = vmatprep.subr.bf16.mxu0 %v2067_v54  ;;  %v1301_v54 = vld [vmem:[%s2970_s3 + $0x78] sm:$0xff] }
  0x33   :  { %745 = vmatmul.mubr.bf16.gmra.mrb[8].mxu0 %v2049_v48  ;;  %1980 = vmatpush3.bf16.msra.mxu1 %v1977_v43  ;;  %v1297_v48 = vld [vmem:[%s2970_s3 + $0x58] sm:$0xff] }
  0x34   :  { %842 = vmatmul.mubr.bf16.gmra.mrb[8].mxu1 %v2050_v49  ;;  %752 = vmatprep.mubr.bf16.mxu0 %v2053_v50  ;;  %v1985_v49 = vpack.c.bf16 %v1297_v48, %v1296_v47  ;;  %v1298_v50 = vld [vmem:[%s2970_s3 + $0x60] sm:$0xff] }
  0x35   :  { %849 = vmatprep.mubr.bf16.mxu1 %v2055_v51  ;;  %1822 = vmatpush3.bf16.msra.mxu0 %v2068_v55  ;;  %v1299_v51 = vld [vmem:[%s2970_s3 + $0x68] sm:$0xff]  ;;  %v1993_v55 = vpack.c.bf16 %v1301_v54, %v1300_v53 }
  0x36   :  { %1823 = vmatprep.subr.bf16.mxu0 %v2075_v60  ;;  %1982 = vmatprep.subr.bf16.mxu1 %v1981_v46  ;;  %v1989_v52 = vpack.c.bf16 %v1299_v51, %v1298_v50 }
  0x37   :  { %1984 = vmatpush3.bf16.msra.mxu1 %v1981_v46 }
  0x38   :  { %1986 = vmatprep.subr.bf16.mxu1 %v1985_v49 }
  0x39   :  { %1824 = vmatpush3.bf16.msra.mxu0 %v2076_v61 }
  0x3a   :  { %1825 = vmatprep.subr.bf16.mxu0 %v2083_v0 }
  0x3b   :  { %753 = vmatmul.mubr.bf16.gmra.mrb[12].mxu0 %v2057_v56  ;;  %1988 = vmatpush3.bf16.msra.mxu1 %v1985_v49 }
  0x3c   :  { %850 = vmatmul.mubr.bf16.gmra.mrb[12].mxu1 %v2058_v57  ;;  %760 = vmatprep.mubr.bf16.mxu0 %v2061_v58 }
  0x3d   :  { %857 = vmatprep.mubr.bf16.mxu1 %v2063_v59  ;;  %1826 = vmatpush3.bf16.msra.mxu0 %v2084_v1 }
  0x3e   :  { %1827 = vmatprep.subr.bf16.mxu0 %v2091_v4  ;;  %1990 = vmatprep.subr.bf16.mxu1 %v1989_v52 }
  0x3f   :  { %1992 = vmatpush3.bf16.msra.mxu1 %v1989_v52 }
  0x40   :  { %1994 = vmatprep.subr.bf16.mxu1 %v1993_v55 }
  0x41   :  { %1828 = vmatpush3.bf16.msra.mxu0 %v2092_v5 }
  0x43   :  { %761 = vmatmul.mubr.bf16.gmra.mrb[16].mxu0 %v2065_v62  ;;  %1996 = vmatpush3.bf16.msra.mxu1 %v1993_v55 }
  0x44   :  { %858 = vmatmul.mubr.bf16.gmra.mrb[16].mxu1 %v2066_v63  ;;  %768 = vmatprep.mubr.bf16.mxu0 %v2069_v2 }
  0x45   :  { %865 = vmatprep.mubr.bf16.mxu1 %v2071_v3 }
  0x4b   :  { %769 = vmatmul.mubr.bf16.gmra.mrb[20].mxu0 %v2073_v6 }
  0x4c   :  { %866 = vmatmul.mubr.bf16.gmra.mrb[20].mxu1 %v2074_v7  ;;  %776 = vmatprep.mubr.bf16.mxu0 %v2077_v8 }
  0x4d   :  { %873 = vmatprep.mubr.bf16.mxu1 %v2079_v9 }
  0x53   :  { %777 = vmatmul.mubr.bf16.gmra.mrb[24].mxu0 %v2081_v10 }
  0x54   :  { %874 = vmatmul.mubr.bf16.gmra.mrb[24].mxu1 %v2082_v11  ;;  %784 = vmatprep.mubr.bf16.mxu0 %v2085_v12 }
  0x55   :  { %881 = vmatprep.mubr.bf16.mxu1 %v2087_v13 }
  0x5b   :  { %785 = vmatmul.mubr.bf16.gmra.mrb[28].mxu0 %v2089_v14 }
  0x5c   :  { %882 = vmatmul.mubr.bf16.gmra.mrb[28].mxu1 %v2090_v15  ;;  %922 = vmatprep.mubr.bf16.mxu0 %v2095_v16 }
  0x63   :  { %923 = vmatmul.mubr.bf16.vlgmr.msra.gmra.mrb[32].mxu0 %v2093_v17 }
  0x64   :  { %930 = vmatprep.mubr.bf16.mxu0 %v2096_v18 }
  0x6b   :  { %931 = vmatmul.mubr.bf16.gmra.mrb[36].mxu0 %v2098_v19 }
  0x6c   :  { %938 = vmatprep.mubr.bf16.mxu0 %v2099_v20 }
  0x73   :  { %939 = vmatmul.mubr.bf16.gmra.mrb[40].mxu0 %v2101_v21 }
  0x74   :  { %946 = vmatprep.mubr.bf16.mxu0 %v2102_v22 }
  0x7b   :  { %947 = vmatmul.mubr.bf16.gmra.mrb[44].mxu0 %v2104_v23 }
  0x7c   :  { %954 = vmatprep.mubr.bf16.mxu0 %v2105_v24 }
  0x83   :  { %955 = vmatmul.mubr.bf16.gmra.mrb[48].mxu0 %v2107_v25 }
  0x84   :  { %962 = vmatprep.mubr.bf16.mxu0 %v2108_v26 }
  0x8b   :  { %963 = vmatmul.mubr.bf16.gmra.mrb[52].mxu0 %v2110_v27 }
  0x8c   :  { %970 = vmatprep.mubr.bf16.mxu0 %v2111_v28 }
  0x93   :  { %971 = vmatmul.mubr.bf16.gmra.mrb[56].mxu0 %v2113_v29 }
  0x94   :  { %978 = vmatprep.mubr.bf16.mxu0 %v2114_v30 }
  0x9b   :  { %979 = vmatmul.mubr.bf16.gmra.mrb[60].mxu0 %v2116_v31 }
  0xf6   :  { %v1701_v56 = vpop.f32.mrb[0].mxu0 }
  0xf7   :  { %v1765_v57 = vpop.f32.mrb[0].mxu1  ;;  %v1702_v58 = vpop.f32.mrb[1].mxu0 }
  0xf8   :  { %v1703_v59 = vadd.f32 %v1702_v58, %v1701_v56  ;;  %v1766_v60 = vpop.f32.mrb[1].mxu1  ;;  %v1704_v61 = vpop.f32.mrb[2].mxu0 }
  0xf9   :  { %v1767_v62 = vadd.f32 %v1766_v60, %v1765_v57  ;;  %v1768_v63 = vpop.f32.mrb[2].mxu1  ;;  %v1705_v0 = vpop.f32.mrb[3].mxu0 }
  0xfa   :  { %v1706_v1 = vadd.f32 %v1705_v0, %v1704_v61  ;;  %v1769_v2 = vpop.f32.mrb[3].mxu1 }
  0xfb   :  { %v2488_v3 = vadd.f32 %v1767_v62, %v1703_v59  ;;  %v1770_v4 = vadd.f32 %v1769_v2, %v1768_v63 }
  0xfd   :  { %v2490_v5 = vadd.f32 %v1770_v4, %v1706_v1 }
  0xfe   :  { %v1707_v6 = vpop.f32.mrb[4].mxu0 }
  0xff   :  { %v1771_v7 = vpop.f32.mrb[4].mxu1  ;;  %v1708_v8 = vpop.f32.mrb[5].mxu0 }
 0x100   :  { %v1709_v9 = vadd.f32 %v1708_v8, %v1707_v6  ;;  %v1772_v10 = vpop.f32.mrb[5].mxu1  ;;  %v1710_v11 = vpop.f32.mrb[6].mxu0 }
 0x101   :  { %v1773_v12 = vadd.f32 %v1772_v10, %v1771_v7  ;;  %v1774_v13 = vpop.f32.mrb[6].mxu1  ;;  %v1711_v14 = vpop.f32.mrb[7].mxu0 }
 0x102   :  { %v1712_v15 = vadd.f32 %v1711_v14, %v1710_v11  ;;  %v1775_v16 = vpop.f32.mrb[7].mxu1 }
 0x103   :  { %v2492_v17 = vadd.f32 %v1773_v12, %v1709_v9  ;;  %v1776_v18 = vadd.f32 %v1775_v16, %v1774_v13 }
 0x105   :  { %v2494_v19 = vadd.f32 %v1776_v18, %v1712_v15 }
 0x106   :  { %v1713_v20 = vpop.f32.mrb[8].mxu0 }
 0x107   :  { %v1777_v21 = vpop.f32.mrb[8].mxu1  ;;  %v1714_v22 = vpop.f32.mrb[9].mxu0 }
 0x108   :  { %v1715_v23 = vadd.f32 %v1714_v22, %v1713_v20  ;;  %v1778_v24 = vpop.f32.mrb[9].mxu1  ;;  %v1716_v25 = vpop.f32.mrb[10].mxu0 }
 0x109   :  { %v1779_v26 = vadd.f32 %v1778_v24, %v1777_v21  ;;  %v1780_v27 = vpop.f32.mrb[10].mxu1  ;;  %v1717_v28 = vpop.f32.mrb[11].mxu0 }
 0x10a   :  { %v1718_v29 = vadd.f32 %v1717_v28, %v1716_v25  ;;  %v1781_v30 = vpop.f32.mrb[11].mxu1 }
 0x10b   :  { %v2496_v31 = vadd.f32 %v1779_v26, %v1715_v23  ;;  %v1782_v32 = vadd.f32 %v1781_v30, %v1780_v27 }
 0x10d   :  { %v2498_v33 = vadd.f32 %v1782_v32, %v1718_v29 }
 0x10e   :  { %v1719_v34 = vpop.f32.mrb[12].mxu0 }
 0x10f   :  { %v1783_v35 = vpop.f32.mrb[12].mxu1  ;;  %v1720_v36 = vpop.f32.mrb[13].mxu0 }
 0x110   :  { %v1721_v37 = vadd.f32 %v1720_v36, %v1719_v34  ;;  %v1784_v38 = vpop.f32.mrb[13].mxu1  ;;  %v1722_v39 = vpop.f32.mrb[14].mxu0 }
 0x111   :  { %v1785_v40 = vadd.f32 %v1784_v38, %v1783_v35  ;;  %v1786_v41 = vpop.f32.mrb[14].mxu1  ;;  %v1723_v42 = vpop.f32.mrb[15].mxu0  ;;  %v988_v35 = vlaneseq }
 0x112   :  { %v1724_v43 = vadd.f32 %v1723_v42, %v1722_v39  ;;  %v1787_v44 = vpop.f32.mrb[15].mxu1 }
 0x113   :  { %v2500_v45 = vadd.f32 %v1785_v40, %v1721_v37  ;;  %v1788_v46 = vadd.f32 %v1787_v44, %v1786_v41 }
 0x115   :  { %v2502_v47 = vadd.f32 %v1788_v46, %v1724_v43 }
 0x116   :  { %v1725_v48 = vpop.f32.mrb[16].mxu0 }
 0x117   :  { %v1789_v49 = vpop.f32.mrb[16].mxu1  ;;  %v1726_v50 = vpop.f32.mrb[17].mxu0 }
 0x118   :  { %v1727_v51 = vadd.f32 %v1726_v50, %v1725_v48  ;;  %v1790_v52 = vpop.f32.mrb[17].mxu1  ;;  %v1728_v53 = vpop.f32.mrb[18].mxu0  ;;  %v2518_v48 = vshrl.u32 %v988_v35, 7 }
 0x119   :  { %v1791_v54 = vadd.f32 %v1790_v52, %v1789_v49  ;;  %v1792_v55 = vpop.f32.mrb[18].mxu1  ;;  %v1729_v56 = vpop.f32.mrb[19].mxu0 }
 0x11a   :  { %v1730_v57 = vadd.f32 %v1729_v56, %v1728_v53  ;;  %v1793_v58 = vpop.f32.mrb[19].mxu1  ;;  %v990_v52 = vsub.s32 0, %v2518_v48  ;;  %v1045_v56 = vsub.s32 1, %v2518_v48  ;;  %vm1026_vm0 = vcmp.lt.s32.totalorder %v2518_v48, 7 }
 0x11b   :  { %v2504_v59 = vadd.f32 %v1791_v54, %v1727_v51  ;;  %v1794_v60 = vadd.f32 %v1793_v58, %v1792_v55  ;;  %v987_v55 = vld [vmem:[%s2971_s2] sm:$0x1f]  ;;  %v1114_v58 = vsub.s32 2, %v2518_v48  ;;  %vm1095_vm1 = vcmp.lt.s32.totalorder %v2518_v48, 6 }
 0x11c   :  { %vm1164_vm2 = vcmp.lt.s32.totalorder %v2518_v48, 5  ;;  %vm1233_vm3 = vcmp.lt.s32.totalorder %v2518_v48, 4 }
 0x11d   :  { %v2506_v61 = vadd.f32 %v1794_v60, %v1730_v57 }
 0x11e   :  { %v1731_v62 = vpop.f32.mrb[20].mxu0 }
 0x11f   :  { %v1795_v63 = vpop.f32.mrb[20].mxu1  ;;  %v1732_v0 = vpop.f32.mrb[21].mxu0 }
 0x120   :  { %v1733_v1 = vadd.f32 %v1732_v0, %v1731_v62  ;;  %v1796_v2 = vpop.f32.mrb[21].mxu1  ;;  %v1734_v4 = vpop.f32.mrb[22].mxu0  ;;  %v1183_v0 = vsub.s32 3, %v2518_v48 }
 0x121   :  { %v1797_v6 = vadd.f32 %v1796_v2, %v1795_v63  ;;  %v1798_v7 = vpop.f32.mrb[22].mxu1  ;;  %v1735_v8 = vpop.f32.mrb[23].mxu0  ;;  %v2531_v63 = vrot.slane %v987_v55, %v990_v52 }
 0x122   :  { %v1736_v9 = vadd.f32 %v1735_v8, %v1734_v4  ;;  %v1799_v10 = vpop.f32.mrb[23].mxu1  ;;  %v2537_v4 = vrot.slane %v987_v55, %v1045_v56 }
 0x123   :  { %v2508_v11 = vadd.f32 %v1797_v6, %v1733_v1  ;;  %v1800_v12 = vadd.f32 %v1799_v10, %v1798_v7  ;;  %v1252_v1 = vsub.s32 4, %v2518_v48  ;;  %v2542_v7 = vrot.slane %v987_v55, %v1114_v58  ;;  %v2927_v48 = vld [vmem:[%s2973_s5 + $0x8] sm:$0xff] }
 0x125   :  { %v2510_v13 = vadd.f32 %v1800_v12, %v1736_v9 }
 0x126   :  { %v1737_v14 = vpop.f32.mrb[24].mxu0 }
 0x127   :  { %v1801_v15 = vpop.f32.mrb[24].mxu1  ;;  %v1738_v16 = vpop.f32.mrb[25].mxu0 }
 0x128   :  { %v1739_v18 = vadd.f32 %v1738_v16, %v1737_v14  ;;  %v1802_v20 = vpop.f32.mrb[25].mxu1  ;;  %v1740_v21 = vpop.f32.mrb[26].mxu0 }
 0x129   :  { %v1803_v22 = vadd.f32 %v1802_v20, %v1801_v15  ;;  %v1804_v23 = vpop.f32.mrb[26].mxu1  ;;  %v1741_v24 = vpop.f32.mrb[27].mxu0  ;;  %v2546_v15 = vrot.slane %v987_v55, %v1183_v0 }
 0x12a   :  { %v1742_v25 = vadd.f32 %v1741_v24, %v1740_v21  ;;  %v1805_v26 = vpop.f32.mrb[27].mxu1 }
 0x12b   :  { %v2512_v27 = vadd.f32 %v1803_v22, %v1739_v18  ;;  %v1806_v28 = vadd.f32 %v1805_v26, %v1804_v23 }
 0x12d   :  { %v2514_v29 = vadd.f32 %v1806_v28, %v1742_v25 }
 0x12e   :  { %v1743_v30 = vpop.f32.mrb[28].mxu0 }
 0x12f   :  { %v1807_v32 = vpop.f32.mrb[28].mxu1  ;;  %v1744_v34 = vpop.f32.mrb[29].mxu0 }
 0x130   :  { %v1745_v36 = vadd.f32 %v1744_v34, %v1743_v30  ;;  %v1808_v37 = vpop.f32.mrb[29].mxu1  ;;  %v1746_v38 = vpop.f32.mrb[30].mxu0  ;;  %v2565_v30 = vrot.slane %v987_v55, %v1252_v1 }
 0x131   :  { %v1809_v39 = vadd.f32 %v1808_v37, %v1807_v32  ;;  %v1810_v40 = vpop.f32.mrb[30].mxu1  ;;  %v1747_v41 = vpop.f32.mrb[31].mxu0 }
 0x132   :  { %v1748_v42 = vadd.f32 %v1747_v41, %v1746_v38  ;;  %v1811_v43 = vpop.f32.mrb[31].mxu1 }
 0x133   :  { %v2516_v44 = vadd.f32 %v1809_v39, %v1745_v36  ;;  %v1812_v46 = vadd.f32 %v1811_v43, %v1810_v40 }
 0x135   :  { %v2520_v49 = vadd.f32 %v1812_v46, %v1748_v42 }
 0x136   :  { %v1829_v50 = vpop.f32.mrb[32].mxu0 }
 0x137   :  { %v1830_v51 = vpop.f32.mrb[33].mxu0 }
 0x138   :  { %v1831_v53 = vadd.f32 %v1830_v51, %v1829_v50  ;;  %v1832_v54 = vpop.f32.mrb[34].mxu0 }
 0x139   :  { %v1833_v57 = vpop.f32.mrb[35].mxu0 }
 0x13a   :  { %v2529_v60 = vadd.f32 %v1831_v53, %v2488_v3  ;;  %v1834_v62 = vadd.f32 %v1833_v57, %v1832_v54 }
 0x13c   :  { %v928_v2 = vadd.f32 %v1834_v62, %v2490_v5  ;;  %v1008_v6 = vrot.slane %v2529_v60, 1  ;;  %v1079_v3 = vrot.slane %v2529_v60, 2  ;;  %v1148_v12 = vrot.slane %v2529_v60, 3 }
 0x13d   :  { %v1217_v16 = vrot.slane %v2529_v60, 4  ;;  %v992_v26 = vmul.f32 %v2531_v63, %v2529_v60 }
 0x13e   :  { %v1009_v8 = vrot.slane %v928_v2, 1  ;;  %v1080_v9 = vrot.slane %v928_v2, 2  ;;  %v1835_v10 = vpop.f32.mrb[36].mxu0  ;;  %v1149_v5 = vrot.slane %v928_v2, 3  ;;  %v1218_v18 = vrot.slane %v928_v2, 4 }
 0x13f   :  { %v1836_v14 = vpop.f32.mrb[37].mxu0  ;;  %v993_v36 = vmul.f32 %v2531_v63, %v928_v2 }
 0x140   :  { %v1837_v20 = vadd.f32 %v1836_v14, %v1835_v10  ;;  %v1838_v21 = vpop.f32.mrb[38].mxu0  ;;  %v1041_v22 = vsel %vm1026_vm0, %v1008_v6, %v1009_v8  ;;  %v1110_v23 = vsel %vm1095_vm1, %v1079_v3, %v1080_v9  ;;  %v1179_v24 = vsel %vm1164_vm2, %v1148_v12, %v1149_v5 }
 0x141   :  { %v1839_v25 = vpop.f32.mrb[39].mxu0  ;;  %v1047_v28 = vmul.f32 %v2537_v4, %v1041_v22  ;;  %v1248_v35 = vsel %vm1233_vm3, %v1217_v16, %v1218_v18  ;;  %v1116_v38 = vmul.f32 %v2542_v7, %v1110_v23  ;;  %v1185_v39 = vmul.f32 %v2546_v15, %v1179_v24 }
 0x142   :  { %v933_v32 = vadd.f32 %v1837_v20, %v2492_v17  ;;  %v1840_v34 = vadd.f32 %v1839_v25, %v1838_v21  ;;  %v1254_v50 = vmul.f32 %v2565_v30, %v1248_v35 }
 0x143   :  { %v1063_v37 = vadd.f32 %v1047_v28, %v992_v26 }
 0x144   :  { %v1010_v40 = vrot.slane %v933_v32, 1  ;;  %v1081_v41 = vrot.slane %v933_v32, 2  ;;  %v1150_v42 = vrot.slane %v933_v32, 3  ;;  %v1219_v43 = vrot.slane %v933_v32, 4 }
 0x145   :  { %v2576_v46 = vadd.f32 %v1840_v34, %v2494_v19  ;;  %v1132_v17 = vadd.f32 %v1116_v38, %v1063_v37  ;;  %v994_v51 = vmul.f32 %v2531_v63, %v933_v32 }
 0x146   :  { %v1040_v52 = vsel %vm1026_vm0, %v1009_v8, %v1010_v40  ;;  %v1841_v53 = vpop.f32.mrb[40].mxu0  ;;  %v1109_v54 = vsel %vm1095_vm1, %v1080_v9, %v1081_v41  ;;  %v1178_v55 = vsel %vm1164_vm2, %v1149_v5, %v1150_v42  ;;  %v1247_v56 = vsel %vm1233_vm3, %v1218_v18, %v1219_v43 }
 0x147   :  { %v1011_v19 = vrot.slane %v2576_v46, 1  ;;  %v1082_v57 = vrot.slane %v2576_v46, 2  ;;  %v1842_v58 = vpop.f32.mrb[41].mxu0  ;;  %v1201_v62 = vadd.f32 %v1185_v39, %v1132_v17  ;;  %v1048_v0 = vmul.f32 %v2537_v4, %v1040_v52 }
 0x148   :  { %v1843_v1 = vadd.f32 %v1842_v58, %v1841_v53  ;;  %v1844_v2 = vpop.f32.mrb[42].mxu0  ;;  %v1117_v8 = vmul.f32 %v2542_v7, %v1109_v54  ;;  %v1186_v9 = vmul.f32 %v2546_v15, %v1178_v55  ;;  %v1255_v10 = vmul.f32 %v2565_v30, %v1247_v56 }
 0x149   :  { %v1845_v5 = vpop.f32.mrb[43].mxu0  ;;  %v1270_v14 = vadd.f32 %v1254_v50, %v1201_v62  ;;  %v1064_v20 = vadd.f32 %v1048_v0, %v993_v36  ;;  %v1039_v18 = vsel %vm1026_vm0, %v1010_v40, %v1011_v19  ;;  %v1108_v21 = vsel %vm1095_vm1, %v1081_v41, %v1082_v57 }
 0x14a   :  { %v2599_v22 = vadd.f32 %v1843_v1, %v2496_v31  ;;  %v1846_v23 = vadd.f32 %v1845_v5, %v1844_v2  ;;  %v1049_v24 = vmul.f32 %v2537_v4, %v1039_v18  ;;  %v1118_v25 = vmul.f32 %v2542_v7, %v1108_v21 }
 0x14b   :  { %1941 = vmatprep.mubr.f32.mxu1 %v1270_v14  ;;  %v1133_v26 = vadd.f32 %v1117_v8, %v1064_v20  ;;  %v1151_v28 = vrot.slane %v2576_v46, 3  ;;  %v1220_v32 = vrot.slane %v2576_v46, 4  ;;  %v995_v34 = vmul.f32 %v2531_v63, %v2576_v46 }
 0x14c   :  { %v1012_v35 = vrot.slane %v2599_v22, 1  ;;  %v1083_v36 = vrot.slane %v2599_v22, 2  ;;  %v2610_v31 = vadd.f32 %v1846_v23, %v2498_v33  ;;  %v1065_v37 = vadd.f32 %v1049_v24, %v994_v51 }
 0x14d   :  { %v1202_v38 = vadd.f32 %v1186_v9, %v1133_v26  ;;  %v1177_v39 = vsel %vm1164_vm2, %v1150_v42, %v1151_v28  ;;  %v1246_v40 = vsel %vm1233_vm3, %v1219_v43, %v1220_v32  ;;  %v1152_v41 = vrot.slane %v2599_v22, 3 }
 0x14e   :  { %v1013_v17 = vrot.slane %v2610_v31, 1  ;;  %v1084_v46 = vrot.slane %v2610_v31, 2  ;;  %v1847_v50 = vpop.f32.mrb[44].mxu0  ;;  %v1134_v52 = vadd.f32 %v1118_v25, %v1065_v37  ;;  %v1187_v53 = vmul.f32 %v2546_v15, %v1177_v39 }
 0x14f   :  { %v1848_v33 = vpop.f32.mrb[45].mxu0  ;;  %v1271_v54 = vadd.f32 %v1255_v10, %v1202_v38  ;;  %v1256_v51 = vmul.f32 %v2565_v30, %v1246_v40  ;;  %v1038_v42 = vsel %vm1026_vm0, %v1011_v19, %v1012_v35  ;;  %v1107_v43 = vsel %vm1095_vm1, %v1082_v57, %v1083_v36 }
 0x150   :  { %v1849_v55 = vadd.f32 %v1848_v33, %v1847_v50  ;;  %v1850_v56 = vpop.f32.mrb[46].mxu0  ;;  %v1203_v58 = vadd.f32 %v1187_v53, %v1134_v52  ;;  %v1050_v62 = vmul.f32 %v2537_v4, %v1038_v42  ;;  %v1119_v0 = vmul.f32 %v2542_v7, %v1107_v43 }
 0x151   :  { %v1851_v1 = vpop.f32.mrb[47].mxu0  ;;  %1942 = vmatmul.mubr.f32.vlgmr.msra.gmra.mrb[32].mxu1 %v1271_v54  ;;  %v1176_v2 = vsel %vm1164_vm2, %v1151_v28, %v1152_v41  ;;  %v1221_v8 = vrot.slane %v2599_v22, 4  ;;  %v996_v19 = vmul.f32 %v2531_v63, %v2599_v22  ;;  %v1037_v57 = vsel %vm1026_vm0, %v1012_v35, %v1013_v17 }
 0x152   :  { %v2635_v9 = vadd.f32 %v1849_v55, %v2500_v45  ;;  %v1852_v10 = vadd.f32 %v1851_v1, %v1850_v56  ;;  %v1272_v5 = vadd.f32 %v1256_v51, %v1203_v58  ;;  %v1066_v14 = vadd.f32 %v1050_v62, %v995_v34 }
 0x153   :  { %v1188_v20 = vmul.f32 %v2546_v15, %v1176_v2  ;;  %v1245_v18 = vsel %vm1233_vm3, %v1220_v32, %v1221_v8  ;;  %v1051_v21 = vmul.f32 %v2537_v4, %v1037_v57  ;;  %v1106_v23 = vsel %vm1095_vm1, %v1083_v36, %v1084_v46 }
 0x154   :  { %v1014_v22 = vrot.slane %v2635_v9, 1  ;;  %v1085_v24 = vrot.slane %v2635_v9, 2  ;;  %v2646_v45 = vadd.f32 %v1852_v10, %v2502_v47  ;;  %1944 = vmatprep.mubr.f32.mxu1 %v1272_v5  ;;  %v1135_v25 = vadd.f32 %v1119_v0, %v1066_v14 }
 0x155   :  { %v1257_v26 = vmul.f32 %v2565_v30, %v1245_v18  ;;  %v1067_v28 = vadd.f32 %v1051_v21, %v996_v19  ;;  %v1120_v34 = vmul.f32 %v2542_v7, %v1106_v23  ;;  %v1153_v32 = vrot.slane %v2610_v31, 3 }
 0x156   :  { %v1015_v35 = vrot.slane %v2646_v45, 1  ;;  %v1086_v36 = vrot.slane %v2646_v45, 2  ;;  %v1853_v37 = vpop.f32.mrb[48].mxu0  ;;  %v1204_v38 = vadd.f32 %v1188_v20, %v1135_v25  ;;  %v1222_v39 = vrot.slane %v2610_v31, 4 }
 0x157   :  { %v1854_v40 = vpop.f32.mrb[49].mxu0  ;;  %v1136_v47 = vadd.f32 %v1120_v34, %v1067_v28  ;;  %v1175_v50 = vsel %vm1164_vm2, %v1152_v41, %v1153_v32  ;;  %v997_v52 = vmul.f32 %v2531_v63, %v2610_v31  ;;  %v1036_v53 = vsel %vm1026_vm0, %v1013_v17, %v1014_v22 }
 0x158   :  { %v1855_v33 = vadd.f32 %v1854_v40, %v1853_v37  ;;  %v1856_v54 = vpop.f32.mrb[50].mxu0  ;;  %v1273_v51 = vadd.f32 %v1257_v26, %v1204_v38  ;;  %v1189_v42 = vmul.f32 %v2546_v15, %v1175_v50  ;;  %v1244_v43 = vsel %vm1233_vm3, %v1221_v8, %v1222_v39 }
 0x159   :  { %v1857_v55 = vpop.f32.mrb[51].mxu0  ;;  %v1258_v56 = vmul.f32 %v2565_v30, %v1244_v43  ;;  %v1052_v58 = vmul.f32 %v2537_v4, %v1036_v53  ;;  %v1105_v41 = vsel %vm1095_vm1, %v1084_v46, %v1085_v24  ;;  %v1154_v31 = vrot.slane %v2635_v9, 3 }
 0x15a   :  { %v2669_v17 = vadd.f32 %v1855_v33, %v2504_v59  ;;  %v1858_v62 = vadd.f32 %v1857_v55, %v1856_v54  ;;  %1945 = vmatmul.mubr.f32.gmra.mrb[34].mxu1 %v1273_v51  ;;  %v1205_v0 = vadd.f32 %v1189_v42, %v1136_v47  ;;  %v1121_v1 = vmul.f32 %v2542_v7, %v1105_v41 }
 0x15b   :  { %v1068_v2 = vadd.f32 %v1052_v58, %v997_v52  ;;  %v1174_v8 = vsel %vm1164_vm2, %v1153_v32, %v1154_v31  ;;  %v1223_v19 = vrot.slane %v2635_v9, 4  ;;  %v998_v57 = vmul.f32 %v2531_v63, %v2635_v9 }
 0x15c   :  { %v1016_v46 = vrot.slane %v2669_v17, 1  ;;  %v1087_v10 = vrot.slane %v2669_v17, 2  ;;  %v2680_v59 = vadd.f32 %v1858_v62, %v2506_v61  ;;  %v1274_v5 = vadd.f32 %v1258_v56, %v1205_v0 }
 0x15d   :  { %v1137_v14 = vadd.f32 %v1121_v1, %v1068_v2  ;;  %v1190_v20 = vmul.f32 %v2546_v15, %v1174_v8  ;;  %v1243_v18 = vsel %vm1233_vm3, %v1222_v39, %v1223_v19  ;;  %v1035_v21 = vsel %vm1026_vm0, %v1014_v22, %v1015_v35 }
 0x15e   :  { %v1017_v23 = vrot.slane %v2680_v59, 1  ;;  %v1088_v9 = vrot.slane %v2680_v59, 2  ;;  %1947 = vmatprep.mubr.f32.mxu1 %v1274_v5  ;;  %v1859_v25 = vpop.f32.mrb[52].mxu0  ;;  %v1259_v26 = vmul.f32 %v2565_v30, %v1243_v18  ;;  %v1053_v61 = vmul.f32 %v2537_v4, %v1035_v21 }
 0x15f   :  { %v1860_v28 = vpop.f32.mrb[53].mxu0  ;;  %v1206_v34 = vadd.f32 %v1190_v20, %v1137_v14  ;;  %v1104_v32 = vsel %vm1095_vm1, %v1085_v24, %v1086_v36  ;;  %v1155_v37 = vrot.slane %v2646_v45, 3  ;;  %v1224_v22 = vrot.slane %v2646_v45, 4 }
 0x160   :  { %v1861_v38 = vadd.f32 %v1860_v28, %v1859_v25  ;;  %v1862_v39 = vpop.f32.mrb[54].mxu0  ;;  %v1069_v40 = vadd.f32 %v1053_v61, %v998_v57  ;;  %v1122_v47 = vmul.f32 %v2542_v7, %v1104_v32  ;;  %v999_v50 = vmul.f32 %v2531_v63, %v2646_v45 }
 0x161   :  { %v1863_v52 = vpop.f32.mrb[55].mxu0  ;;  %v1275_v53 = vadd.f32 %v1259_v26, %v1206_v34  ;;  %v1173_v33 = vsel %vm1164_vm2, %v1154_v31, %v1155_v37  ;;  %v1242_v24 = vsel %vm1233_vm3, %v1223_v19, %v1224_v22  ;;  %v1034_v54 = vsel %vm1026_vm0, %v1015_v35, %v1016_v46 }
 0x162   :  { %v2707_v51 = vadd.f32 %v1861_v38, %v2508_v11  ;;  %v1864_v42 = vadd.f32 %v1863_v52, %v1862_v39  ;;  %v1138_v43 = vadd.f32 %v1122_v47, %v1069_v40  ;;  %v1191_v55 = vmul.f32 %v2546_v15, %v1173_v33 }
 0x163   :  { %1948 = vmatmul.mubr.f32.gmra.mrb[36].mxu1 %v1275_v53  ;;  %v1260_v56 = vmul.f32 %v2565_v30, %v1242_v24  ;;  %v1054_v58 = vmul.f32 %v2537_v4, %v1034_v54  ;;  %v1103_v41 = vsel %vm1095_vm1, %v1086_v36, %v1087_v10  ;;  %v1156_v31 = vrot.slane %v2669_v17, 3 }
 0x164   :  { %v1018_v35 = vrot.slane %v2707_v51, 1  ;;  %v1089_v11 = vrot.slane %v2707_v51, 2  ;;  %v2720_v62 = vadd.f32 %v1864_v42, %v2510_v13  ;;  %v1207_v0 = vadd.f32 %v1191_v55, %v1138_v43 }
 0x165   :  { %v1070_v1 = vadd.f32 %v1054_v58, %v999_v50  ;;  %v1123_v2 = vmul.f32 %v2542_v7, %v1103_v41  ;;  %v1172_v8 = vsel %vm1164_vm2, %v1155_v37, %v1156_v31  ;;  %v1225_v45 = vrot.slane %v2669_v17, 4 }
 0x166   :  { %v1019_v36 = vrot.slane %v2720_v62, 1  ;;  %v1090_v19 = vrot.slane %v2720_v62, 2  ;;  %v1276_v57 = vadd.f32 %v1260_v56, %v1207_v0  ;;  %v1865_v5 = vpop.f32.mrb[56].mxu0  ;;  %v1192_v14 = vmul.f32 %v2546_v15, %v1172_v8 }
 0x167   :  { %v1866_v20 = vpop.f32.mrb[57].mxu0  ;;  %v1139_v13 = vadd.f32 %v1123_v2, %v1070_v1  ;;  %v1241_v18 = vsel %vm1233_vm3, %v1224_v22, %v1225_v45  ;;  %v1000_v21 = vmul.f32 %v2531_v63, %v2669_v17  ;;  %v1033_v25 = vsel %vm1026_vm0, %v1016_v46, %v1017_v23 }
 0x168   :  { %1950 = vmatprep.mubr.f32.mxu1 %v1276_v57  ;;  %v1867_v26 = vadd.f32 %v1866_v20, %v1865_v5  ;;  %v1868_v61 = vpop.f32.mrb[58].mxu0  ;;  %v1261_v28 = vmul.f32 %v2565_v30, %v1241_v18  ;;  %v1055_v34 = vmul.f32 %v2537_v4, %v1033_v25  ;;  %v1102_v32 = vsel %vm1095_vm1, %v1087_v10, %v1088_v9 }
 0x169   :  { %v1869_v37 = vpop.f32.mrb[59].mxu0  ;;  %v1208_v22 = vadd.f32 %v1192_v14, %v1139_v13  ;;  %v1124_v17 = vmul.f32 %v2542_v7, %v1102_v32  ;;  %v1157_v38 = vrot.slane %v2680_v59, 3  ;;  %v1226_v46 = vrot.slane %v2680_v59, 4 }
 0x16a   :  { %v2747_v39 = vadd.f32 %v1867_v26, %v2512_v27  ;;  %v1870_v40 = vadd.f32 %v1869_v37, %v1868_v61  ;;  %v1071_v47 = vadd.f32 %v1055_v34, %v1000_v21  ;;  %v1001_v50 = vmul.f32 %v2531_v63, %v2680_v59 }
 0x16b   :  { %v1277_v52 = vadd.f32 %v1261_v28, %v1208_v22  ;;  %v1171_v10 = vsel %vm1164_vm2, %v1156_v31, %v1157_v38  ;;  %v1240_v53 = vsel %vm1233_vm3, %v1225_v45, %v1226_v46  ;;  %v1032_v33 = vsel %vm1026_vm0, %v1017_v23, %v1018_v35 }
 0x16c   :  { %v1020_v27 = vrot.slane %v2747_v39, 1  ;;  %v1091_v24 = vrot.slane %v2747_v39, 2  ;;  %v2762_v54 = vadd.f32 %v1870_v40, %v2514_v29  ;;  %v1140_v42 = vadd.f32 %v1124_v17, %v1071_v47 }
 0x16d   :  { %1951 = vmatmul.mubr.f32.gmra.mrb[38].mxu1 %v1277_v52  ;;  %v1193_v43 = vmul.f32 %v2546_v15, %v1171_v10  ;;  %v1262_v55 = vmul.f32 %v2565_v30, %v1240_v53  ;;  %v1056_v56 = vmul.f32 %v2537_v4, %v1032_v33  ;;  %v1101_v23 = vsel %vm1095_vm1, %v1088_v9, %v1089_v11 }
 0x16e   :  { %v1021_v58 = vrot.slane %v2762_v54, 1  ;;  %v1092_v41 = vrot.slane %v2762_v54, 2  ;;  %v1871_v31 = vpop.f32.mrb[60].mxu0  ;;  %v1125_v29 = vmul.f32 %v2542_v7, %v1101_v23  ;;  %v1158_v0 = vrot.slane %v2707_v51, 3 }
 0x16f   :  { %v1209_v1 = vadd.f32 %v1193_v43, %v1140_v42  ;;  %v1872_v2 = vpop.f32.mrb[61].mxu0  ;;  %v1072_v8 = vadd.f32 %v1056_v56, %v1001_v50  ;;  %v1227_v45 = vrot.slane %v2707_v51, 4  ;;  %v1002_v59 = vmul.f32 %v2531_v63, %v2707_v51 }
 0x170   :  { %v1873_v57 = vadd.f32 %v1872_v2, %v1871_v31  ;;  %v1874_v5 = vpop.f32.mrb[62].mxu0  ;;  %v1170_v9 = vsel %vm1164_vm2, %v1157_v38, %v1158_v0  ;;  %v1031_v14 = vsel %vm1026_vm0, %v1018_v35, %v1019_v36  ;;  %v1100_v20 = vsel %vm1095_vm1, %v1089_v11, %v1090_v19 }
 0x171   :  { %v1278_v13 = vadd.f32 %v1262_v55, %v1209_v1  ;;  %v1875_v18 = vpop.f32.mrb[63].mxu0  ;;  %v1141_v21 = vadd.f32 %v1125_v29, %v1072_v8  ;;  %v1194_v51 = vmul.f32 %v2546_v15, %v1170_v9  ;;  %v1239_v25 = vsel %vm1233_vm3, %v1226_v46, %v1227_v45 }
 0x172   :  { %v2792_v26 = vadd.f32 %v1873_v57, %v2516_v44  ;;  %v1876_v61 = vadd.f32 %v1875_v18, %v1874_v5  ;;  %v1263_v28 = vmul.f32 %v2565_v30, %v1239_v25  ;;  %v1057_v35 = vmul.f32 %v2537_v4, %v1031_v14 }
 0x173   :  { %1953 = vmatprep.mubr.f32.mxu1 %v1278_v13  ;;  %v1210_v34 = vadd.f32 %v1194_v51, %v1141_v21  ;;  %v1126_v11 = vmul.f32 %v2542_v7, %v1100_v20  ;;  %v1159_v32 = vrot.slane %v2720_v62, 3  ;;  %v1228_v37 = vrot.slane %v2720_v62, 4 }
 0x174   :  { %v1022_v22 = vrot.slane %v2792_v26, 1  ;;  %v1093_v17 = vrot.slane %v2792_v26, 2  ;;  %v2802_v44 = vadd.f32 %v1876_v61, %v2520_v49  ;;  %v1073_v38 = vadd.f32 %v1057_v35, %v1002_v59 }
 0x175   :  { %v1279_v46 = vadd.f32 %v1263_v28, %v1210_v34  ;;  %v1169_v40 = vsel %vm1164_vm2, %v1158_v0, %v1159_v32  ;;  %v1238_v47 = vsel %vm1233_vm3, %v1227_v45, %v1228_v37  ;;  %v1003_v50 = vmul.f32 %v2531_v63, %v2720_v62 }
 0x176   :  { %v1023_v52 = vrot.slane %v2802_v44, 1  ;;  %v1094_v10 = vrot.slane %v2802_v44, 2  ;;  %v1142_v53 = vadd.f32 %v1126_v11, %v1073_v38  ;;  %v1195_v33 = vmul.f32 %v2546_v15, %v1169_v40 }
 0x177   :  { %1954 = vmatmul.mubr.f32.gmra.mrb[40].mxu1 %v1279_v46  ;;  %v1264_v49 = vmul.f32 %v2565_v30, %v1238_v47  ;;  %v1030_v42 = vsel %vm1026_vm0, %v1019_v36, %v1020_v27  ;;  %v1099_v43 = vsel %vm1095_vm1, %v1090_v19, %v1091_v24  ;;  %v1160_v55 = vrot.slane %v2747_v39, 3 }
 0x178   :  { %v1211_v56 = vadd.f32 %v1195_v33, %v1142_v53  ;;  %v1058_v23 = vmul.f32 %v2537_v4, %v1030_v42  ;;  %v1127_v31 = vmul.f32 %v2542_v7, %v1099_v43  ;;  %v1229_v29 = vrot.slane %v2747_v39, 4 }
 0x179   :  { %v1168_v0 = vsel %vm1164_vm2, %v1159_v32, %v1160_v55  ;;  %v1004_v36 = vmul.f32 %v2531_v63, %v2747_v39  ;;  %v1029_v62 = vsel %vm1026_vm0, %v1020_v27, %v1021_v58  ;;  %v1098_v19 = vsel %vm1095_vm1, %v1091_v24, %v1092_v41 }
 0x17a   :  { %v1280_v1 = vadd.f32 %v1264_v49, %v1211_v56  ;;  %v1074_v2 = vadd.f32 %v1058_v23, %v1003_v50  ;;  %v1196_v8 = vmul.f32 %v2546_v15, %v1168_v0  ;;  %v1237_v45 = vsel %vm1233_vm3, %v1228_v37, %v1229_v29 }
 0x17b   :  { %v1265_v59 = vmul.f32 %v2565_v30, %v1237_v45  ;;  %v1059_v39 = vmul.f32 %v2537_v4, %v1029_v62  ;;  %v1128_v57 = vmul.f32 %v2542_v7, %v1098_v19  ;;  %v1161_v27 = vrot.slane %v2762_v54, 3 }
 0x17c   :  { %1956 = vmatprep.mubr.f32.mxu1 %v1280_v1  ;;  %v1143_v5 = vadd.f32 %v1127_v31, %v1074_v2  ;;  %v1230_v9 = vrot.slane %v2762_v54, 4  ;;  %v1005_v24 = vmul.f32 %v2531_v63, %v2762_v54  ;;  %v1028_v14 = vsel %vm1026_vm0, %v1021_v58, %v1022_v22 }
 0x17d   :  { %v1075_v20 = vadd.f32 %v1059_v39, %v1004_v36  ;;  %v1167_v13 = vsel %vm1164_vm2, %v1160_v55, %v1161_v27  ;;  %v1060_v18 = vmul.f32 %v2537_v4, %v1028_v14  ;;  %v1097_v21 = vsel %vm1095_vm1, %v1092_v41, %v1093_v17 }
 0x17e   :  { %v1212_v51 = vadd.f32 %v1196_v8, %v1143_v5  ;;  %v1197_v25 = vmul.f32 %v2546_v15, %v1167_v13  ;;  %v1236_v61 = vsel %vm1233_vm3, %v1229_v29, %v1230_v9  ;;  %v1129_v28 = vmul.f32 %v2542_v7, %v1097_v21 }
 0x17f   :  { %v1144_v58 = vadd.f32 %v1128_v57, %v1075_v20  ;;  %v1266_v35 = vmul.f32 %v2565_v30, %v1236_v61  ;;  %v1076_v34 = vadd.f32 %v1060_v18, %v1005_v24  ;;  %v1162_v11 = vrot.slane %v2792_v26, 3 }
 0x180   :  { %v1281_v32 = vadd.f32 %v1265_v59, %v1212_v51  ;;  %v1231_v54 = vrot.slane %v2792_v26, 4  ;;  %v1006_v41 = vmul.f32 %v2531_v63, %v2792_v26  ;;  %v1027_v37 = vsel %vm1026_vm0, %v1022_v22, %v1023_v52 }
 0x181   :  { %v1213_v38 = vadd.f32 %v1197_v25, %v1144_v58  ;;  %v1145_v46 = vadd.f32 %v1129_v28, %v1076_v34  ;;  %v1166_v40 = vsel %vm1164_vm2, %v1161_v27, %v1162_v11  ;;  %v1061_v47 = vmul.f32 %v2537_v4, %v1027_v37 }
 0x182   :  { %1957 = vmatmul.mubr.f32.gmra.mrb[42].mxu1 %v1281_v32  ;;  %v1198_v50 = vmul.f32 %v2546_v15, %v1166_v40  ;;  %v1235_v53 = vsel %vm1233_vm3, %v1230_v9, %v1231_v54  ;;  %v1096_v26 = vsel %vm1095_vm1, %v1093_v17, %v1094_v10  ;;  %v1163_v22 = vrot.slane %v2802_v44, 3 }
 0x183   :  { %v1282_v33 = vadd.f32 %v1266_v35, %v1213_v38  ;;  %v1077_v49 = vadd.f32 %v1061_v47, %v1006_v41  ;;  %v1130_v42 = vmul.f32 %v2542_v7, %v1096_v26  ;;  %v1267_v55 = vmul.f32 %v2565_v30, %v1235_v53 }
 0x184   :  { %v1214_v43 = vadd.f32 %v1198_v50, %v1145_v46  ;;  %v1165_v56 = vsel %vm1164_vm2, %v1162_v11, %v1163_v22  ;;  %v1232_v23 = vrot.slane %v2802_v44, 4  ;;  %v1042_v17 = vsel %vm1026_vm0, %v1023_v52, %v1008_v6 }
 0x185   :  { %1959 = vmatprep.mubr.f32.mxu1 %v1282_v33  ;;  %v1146_v31 = vadd.f32 %v1130_v42, %v1077_v49  ;;  %v1199_v29 = vmul.f32 %v2546_v15, %v1165_v56  ;;  %v1111_v0 = vsel %vm1095_vm1, %v1094_v10, %v1079_v3  ;;  %v1007_v19 = vmul.f32 %v2531_v63, %v2802_v44 }
 0x186   :  { %v1283_v36 = vadd.f32 %v1267_v55, %v1214_v43  ;;  %v1234_v62 = vsel %vm1233_vm3, %v1231_v54, %v1232_v23  ;;  %v1062_v1 = vmul.f32 %v2537_v4, %v1042_v17  ;;  %v1180_v6 = vsel %vm1164_vm2, %v1163_v22, %v1148_v12  ;;  %v2921_v12 = vld [vmem:[%s2972_s4] ss:$0 sm:$0xff] }
 0x187   :  { %v1215_v2 = vadd.f32 %v1199_v29, %v1146_v31  ;;  %v1268_v8 = vmul.f32 %v2565_v30, %v1234_v62  ;;  %v1131_v3 = vmul.f32 %v2542_v7, %v1111_v0  ;;  %v1249_v63 = vsel %vm1233_vm3, %v1232_v23, %v1217_v16 }
 0x188   :  { %1960 = vmatmul.mubr.f32.gmra.mrb[44].mxu1 %v1283_v36  ;;  %v1078_v52 = vadd.f32 %v1062_v1, %v1007_v19  ;;  %v1200_v4 = vmul.f32 %v2546_v15, %v1180_v6  ;;  %v1269_v59 = vmul.f32 %v2565_v30, %v1249_v63  ;;  %v2933_v30 = vld [vmem:[%s2973_s5] sm:$0xff] }
 0x189   :  { %v1284_v10 = vadd.f32 %v1268_v8, %v1215_v2 }
 0x18a   :  { %v1147_v44 = vadd.f32 %v1131_v3, %v1078_v52 }
 0x18b   :  { %1962 = vmatprep.mubr.f32.mxu1 %v1284_v10 }
 0x18c   :  { %v1216_v45 = vadd.f32 %v1200_v4, %v1147_v44 }
 0x18e   :  { %v1285_v39 = vadd.f32 %v1269_v59, %v1216_v45 }
 0x190   :  { %1963 = vmatmul.mubr.f32.gmra.mrb[46].mxu1 %v1285_v39 }
 0x224   :  { %v1943_v7 = vpop.f32.mrb[32].mxu1 }
 0x225   :  { %v1455_v60 = vadd.f32 %v1943_v7, %v2921_v12  ;;  %v1368_v57 = vpop.f32.mrb[33].mxu1 }
 0x226   :  { %v1454_v15 = vadd.f32 %v2921_v12, %v1368_v57 }
 0x227   :  { %v1471_v16 = vmax.f32 %v1455_v60, 0.0 }
 0x228   :  { %v1470_v27 = vmax.f32 %v1454_v15, 0.0 }
 0x229   :  { %v1489_v5 = vmul.f32 %v2927_v48, %v1471_v16 }
 0x22a   :  { %v1488_v9 = vmul.f32 %v2933_v30, %v1470_v27 }
 0x22c   :  { %v1504_v24 = vmax.f32 %v1488_v9, %v1489_v5 }
 0x22d   :  { %v1946_v14 = vpop.f32.mrb[34].mxu1 }
 0x22e   :  { %v1505_v20 = vrot.slane %v1504_v24, 4  ;;  %v1457_v13 = vadd.f32 %v1946_v14, %v2921_v12  ;;  %v1378_v18 = vpop.f32.mrb[35].mxu1 }
 0x22f   :  { %v1456_v21 = vadd.f32 %v2921_v12, %v1378_v18 }
 0x230   :  { %v1473_v51 = vmax.f32 %v1457_v13, 0.0  ;;  %v1506_v25 = vmax.f32 %v1504_v24, %v1505_v20 }
 0x231   :  { %v1472_v61 = vmax.f32 %v1456_v21, 0.0 }
 0x232   :  { %v1491_v28 = vmul.f32 %v2927_v48, %v1473_v51  ;;  %v1507_v35 = vrot.slane %v1506_v25, 2 }
 0x233   :  { %v1490_v58 = vmul.f32 %v2933_v30, %v1472_v61 }
 0x234   :  { %v1508_v38 = vmax.f32 %v1506_v25, %v1507_v35 }
 0x235   :  { %v1511_v34 = vmax.f32 %v1490_v58, %v1491_v28 }
 0x236   :  { %v1949_v11 = vpop.f32.mrb[36].mxu1  ;;  %v1509_v22 = vrot.slane %v1508_v38, 1 }
 0x237   :  { %v1512_v32 = vrot.slane %v1511_v34, 4  ;;  %v1459_v54 = vadd.f32 %v1949_v11, %v2921_v12  ;;  %v1388_v41 = vpop.f32.mrb[37].mxu1 }
 0x238   :  { %v1458_v37 = vadd.f32 %v2921_v12, %v1388_v41  ;;  %v1510_v56 = vmax.f32 %v1508_v38, %v1509_v22 }
 0x239   :  { %v1513_v46 = vmax.f32 %v1511_v34, %v1512_v32  ;;  %v1475_v40 = vmax.f32 %v1459_v54, 0.0 }
 0x23a   :  { %v1474_v47 = vmax.f32 %v1458_v37, 0.0 }
 0x23b   :  { %v1514_v50 = vrot.slane %v1513_v46, 2  ;;  %v1493_v53 = vmul.f32 %v2927_v48, %v1475_v40 }
 0x23c   :  { %v1492_v26 = vmul.f32 %v2933_v30, %v1474_v47 }
 0x23d   :  { %v1515_v33 = vmax.f32 %v1513_v46, %v1514_v50 }
 0x23e   :  { %v1518_v49 = vmax.f32 %v1492_v26, %v1493_v53 }
 0x23f   :  { %v1516_v42 = vrot.slane %v1515_v33, 1 }
 0x240   :  { %v1519_v43 = vrot.slane %v1518_v49, 4  ;;  %v1952_v55 = vpop.f32.mrb[38].mxu1 }
 0x241   :  { %v1517_v23 = vmax.f32 %v1515_v33, %v1516_v42  ;;  %v1461_v31 = vadd.f32 %v1952_v55, %v2921_v12  ;;  %v1398_v29 = vpop.f32.mrb[39].mxu1 }
 0x242   :  { %v1520_v17 = vmax.f32 %v1518_v49, %v1519_v43  ;;  %v1460_v0 = vadd.f32 %v2921_v12, %v1398_v29 }
 0x243   :  { %v1569_v36 = vsel %vm1568_vm4, %v1517_v23, %v1510_v56  ;;  %v1477_v62 = vmax.f32 %v1461_v31, 0.0 }
 0x244   :  { %v1521_v19 = vrot.slane %v1520_v17, 2  ;;  %v1476_v1 = vmax.f32 %v1460_v0, 0.0 }
 0x245   :  { %v1495_v2 = vmul.f32 %v2927_v48, %v1477_v62 }
 0x246   :  { %v1522_v8 = vmax.f32 %v1520_v17, %v1521_v19  ;;  %v1494_v6 = vmul.f32 %v2933_v30, %v1476_v1 }
 0x248   :  { %v1523_v52 = vrot.slane %v1522_v8, 1  ;;  %v1525_v3 = vmax.f32 %v1494_v6, %v1495_v2 }
 0x24a   :  { %v1524_v10 = vmax.f32 %v1522_v8, %v1523_v52  ;;  %v1526_v63 = vrot.slane %v1525_v3, 4  ;;  %v1955_v44 = vpop.f32.mrb[40].mxu1 }
 0x24b   :  { %v1463_v4 = vadd.f32 %v1955_v44, %v2921_v12  ;;  %v1408_v45 = vpop.f32.mrb[41].mxu1 }
 0x24c   :  { %v1571_v59 = vsel %vm1570_vm5, %v1524_v10, %v1569_v36  ;;  %v1527_v39 = vmax.f32 %v1525_v3, %v1526_v63  ;;  %v1462_v7 = vadd.f32 %v2921_v12, %v1408_v45 }
 0x24d   :  { %v1479_v60 = vmax.f32 %v1463_v4, 0.0 }
 0x24e   :  { %v1528_v57 = vrot.slane %v1527_v39, 2  ;;  %v1478_v15 = vmax.f32 %v1462_v7, 0.0 }
 0x24f   :  { %v1497_v16 = vmul.f32 %v2927_v48, %v1479_v60 }
 0x250   :  { %v1529_v27 = vmax.f32 %v1527_v39, %v1528_v57  ;;  %v1496_v5 = vmul.f32 %v2933_v30, %v1478_v15 }
 0x252   :  { %v1530_v9 = vrot.slane %v1529_v27, 1  ;;  %v1532_v24 = vmax.f32 %v1496_v5, %v1497_v16 }
 0x254   :  { %v1531_v14 = vmax.f32 %v1529_v27, %v1530_v9  ;;  %v1533_v20 = vrot.slane %v1532_v24, 4 }
 0x255   :  { %v1958_v13 = vpop.f32.mrb[42].mxu1 }
 0x256   :  { %v1573_v18 = vsel %vm1572_vm6, %v1531_v14, %v1571_v59  ;;  %v1534_v21 = vmax.f32 %v1532_v24, %v1533_v20  ;;  %v1465_v51 = vadd.f32 %v1958_v13, %v2921_v12  ;;  %v1418_v25 = vpop.f32.mrb[43].mxu1 }
 0x257   :  { %v1464_v61 = vadd.f32 %v2921_v12, %v1418_v25 }
 0x258   :  { %v1535_v28 = vrot.slane %v1534_v21, 2  ;;  %v1481_v58 = vmax.f32 %v1465_v51, 0.0 }
 0x259   :  { %v1480_v35 = vmax.f32 %v1464_v61, 0.0 }
 0x25a   :  { %v1536_v34 = vmax.f32 %v1534_v21, %v1535_v28  ;;  %v1499_v11 = vmul.f32 %v2927_v48, %v1481_v58 }
 0x25b   :  { %v1498_v32 = vmul.f32 %v2933_v30, %v1480_v35  ;;  %v1961_v54 = vpop.f32.mrb[44].mxu1 }
 0x25c   :  { %v1537_v41 = vrot.slane %v1536_v34, 1  ;;  %v1467_v37 = vadd.f32 %v1961_v54, %v2921_v12  ;;  %v1428_v38 = vpop.f32.mrb[45].mxu1 }
 0x25d   :  { %v1539_v46 = vmax.f32 %v1498_v32, %v1499_v11  ;;  %v1466_v40 = vadd.f32 %v2921_v12, %v1428_v38 }
 0x25e   :  { %v1538_v47 = vmax.f32 %v1536_v34, %v1537_v41  ;;  %v1483_v50 = vmax.f32 %v1467_v37, 0.0 }
 0x25f   :  { %v1540_v53 = vrot.slane %v1539_v46, 4  ;;  %v1482_v26 = vmax.f32 %v1466_v40, 0.0 }
 0x260   :  { %v1575_v22 = vsel %vm1574_vm7, %v1538_v47, %v1573_v18  ;;  %v1501_v33 = vmul.f32 %v2927_v48, %v1483_v50 }
 0x261   :  { %v1541_v49 = vmax.f32 %v1539_v46, %v1540_v53  ;;  %v1500_v42 = vmul.f32 %v2933_v30, %v1482_v26 }
 0x263   :  { %v1542_v43 = vrot.slane %v1541_v49, 2  ;;  %v1546_v55 = vmax.f32 %v1500_v42, %v1501_v33  ;;  %v1964_v56 = vpop.f32.mrb[46].mxu1 }
 0x264   :  { %v1469_v23 = vadd.f32 %v1964_v56, %v2921_v12  ;;  %v1438_v31 = vpop.f32.mrb[47].mxu1 }
 0x265   :  { %v1543_v29 = vmax.f32 %v1541_v49, %v1542_v43  ;;  %v1547_v17 = vrot.slane %v1546_v55, 4  ;;  %v1468_v0 = vadd.f32 %v2921_v12, %v1438_v31 }
 0x266   :  { %v1485_v36 = vmax.f32 %v1469_v23, 0.0 }
 0x267   :  { %v1544_v62 = vrot.slane %v1543_v29, 1  ;;  %v1548_v19 = vmax.f32 %v1546_v55, %v1547_v17  ;;  %v1484_v1 = vmax.f32 %v1468_v0, 0.0 }
 0x268   :  { %v1503_v2 = vmul.f32 %v2927_v48, %v1485_v36 }
 0x269   :  { %v1545_v8 = vmax.f32 %v1543_v29, %v1544_v62  ;;  %v1549_v6 = vrot.slane %v1548_v19, 2  ;;  %v1502_v52 = vmul.f32 %v2933_v30, %v1484_v1 }
 0x26b   :  { %v1577_v3 = vsel %vm1576_vm8, %v1545_v8, %v1575_v22  ;;  %v1550_v10 = vmax.f32 %v1548_v19, %v1549_v6  ;;  %v1553_v63 = vmax.f32 %v1502_v52, %v1503_v2 }
 0x26d   :  { %v1551_v44 = vrot.slane %v1550_v10, 1  ;;  %v1554_v4 = vrot.slane %v1553_v63, 4 }
 0x26f   :  { %v1552_v45 = vmax.f32 %v1550_v10, %v1551_v44  ;;  %v1555_v59 = vmax.f32 %v1553_v63, %v1554_v4 }
 0x271   :  { %v1579_v12 = vsel %vm1578_vm9, %v1552_v45, %v1577_v3  ;;  %v1556_v39 = vrot.slane %v1555_v59, 2 }
 0x273   :  { %v1557_v7 = vmax.f32 %v1555_v59, %v1556_v39 }
 0x275   :  { %v1558_v60 = vrot.slane %v1557_v7, 1 }
 0x277   :  { %v1559_v57 = vmax.f32 %v1557_v7, %v1558_v60 }
 0x279   :  { %v1581_v15 = vsel %vm1580_vm10, %v1559_v57, %v1579_v12 }
 0x27a   :  { %1583 = vst [vmem:[%s2974_s6] sm:$0xff] %v1581_v15 }

</bundles_post_ra>
